<compile_context>
chip_gen: v6e
topology: v6e:2x2x1
jax: 0.10.0
libtpu: 0.0.40
codegen_flags: <defaults>
</compile_context>

<pallas_src>
import functools
import math

import jax
import jax.numpy as jnp
from jax.experimental import pallas as pl
from jax.experimental.pallas import tpu as pltpu


# --------------------------------------------------------------------------- #
# Kernel
# --------------------------------------------------------------------------- #
def _text_encoder_kernel(x_ref, wqkv_ref, wo_ref, wf_ref, b_ref, out_ref, *,
                         true_d):
    """One grid step == B_TILE batch elements.

    x_ref:    (Bt, S, D)        bf16
    wqkv_ref: (D, 3*Dp)         bf16  fused Wq|Wk|Wv, each in a 128-aligned band
    wo_ref:   (Dp, Dp)          bf16  zero-padded
    wf_ref:   (Dp, Dout_pad)    bf16  zero-padded
    b_ref:    (3, L)            f32   row0=b_qkv, row1=b_o, row2=b_f (zero-padded)
    out_ref:  (Bt, Dout_pad)    f32
    """
    bt, s_len, d_in = x_ref.shape
    dp = wo_ref.shape[0]
    dout_p = wf_ref.shape[1]
    scale = 1.0 / math.sqrt(true_d)

    # --- fused QKV projection: one wide bf16 MXU matmul ---------------------
    x2 = x_ref[...].reshape(bt * s_len, d_in)                       # (Bt*S, D) bf16
    qkv = jnp.dot(x2, wqkv_ref[...],
                  preferred_element_type=jnp.float32)               # (Bt*S, 3Dp) f32
    qkv = qkv + b_ref[0:1, :3 * dp]
    qkv = qkv.reshape(bt, s_len, 3 * dp)

    # 128-aligned splits -> free vreg views; feed the MXU bf16 operands.
    q = qkv[..., :dp].astype(jnp.bfloat16)
    k = qkv[..., dp:2 * dp].astype(jnp.bfloat16)
    v = qkv[..., 2 * dp:]                                           # f32 for pooling

    # --- scores: contract last dims, bf16 operands, f32 accumulate ----------
    s = jnp.einsum("bqd,bkd->bqk", q, k,
                   preferred_element_type=jnp.float32) * scale      # (Bt, S, S)
    s = s - jnp.max(s, axis=-1, keepdims=True)
    p = jnp.exp(s)
    p = p * pl.reciprocal(jnp.sum(p, axis=-1, keepdims=True), approx=True)

    # --- mean pool (linearity: pool the probabilities, then project) --------
    p_mean = jnp.mean(p, axis=1)                                    # (Bt, S)
    pooled = jnp.sum(p_mean[..., None] * v, axis=1)                 # (Bt, Dp)

    o = jnp.dot(pooled.astype(jnp.bfloat16), wo_ref[...],
                preferred_element_type=jnp.float32) + b_ref[1:2, :dp]
    y = jnp.dot(o.astype(jnp.bfloat16), wf_ref[...],
                preferred_element_type=jnp.float32) + b_ref[2:3, :dout_p]

    # --- F.normalize(dim=1): y / max(||y||, 1e-12); padded lanes are exactly 0
    nsq = jnp.sum(y * y, axis=-1, keepdims=True)
    y = y * jax.lax.rsqrt(jnp.maximum(nsq, 1e-24))

    out_ref[...] = y.astype(out_ref.dtype)


# --------------------------------------------------------------------------- #
# VMEM budgeting / tile selection
# --------------------------------------------------------------------------- #
def _round_up(n, m):
    return ((n + m - 1) // m) * m


def _vmem_capacity_bytes():
    try:
        return int(pltpu.get_tpu_info().vmem_capacity_bytes)
    except Exception:
        return 64 << 20  # conservative: v7x per-TensorCore VMEM


def _weight_vmem_bytes(d, dp, dout_p, bias_len, buffers):
    w = d * 3 * dp * 2 + dp * dp * 2 + dp * dout_p * 2 + 3 * bias_len * 4
    return buffers * w


def _tile_vmem_bytes(bt, s, d, dp, dout_p):
    """Per-step VMEM: pipelined x/out blocks + f32 in-kernel intermediates."""
    x_blk = 2 * bt * s * d * 2              # bf16 x, double-buffered
    out_blk = 2 * bt * dout_p * 4           # f32 out, double-buffered
    qkv = bt * s * 3 * dp * (4 + 2)         # f32 qkv + bf16 q/k copies
    scores = 2 * bt * s * s * 4             # s and p, f32
    misc = bt * (s + 2 * dp + dout_p) * 4   # p_mean / pooled / o / y
    return x_blk + out_blk + qkv + scores + misc


def _pick_b_tile(B, S, fits):
    """Largest useful batch tile that fits VMEM.

    Prefers (in order): sublane-conforming tiles (multiple of 8 or the full
    batch), an even number of grid steps (v7x megacore), >= 2 steps, and the
    smallest tile that still presents >= 256 MXU rows per step.
    """
    cands = [t for t in range(B, 0, -1)
             if B % t == 0 and (t % 8 == 0 or t == B)]
    fitting = [t for t in cands if fits(t)]
    if not fitting:
        fitting = [t for t in range(B, 0, -1) if B % t == 0 and fits(t)] or [1]
    two_step = [t for t in fitting if B // t >= 2]
    even_step = [t for t in (two_step or fitting) if (B // t) % 2 == 0]
    pool = even_step or two_step or fitting
    target_bt = -(-256 // S)                 # rows to fill a 256-row MXU pass
    reaching = [t for t in pool if t >= target_bt]
    return min(reaching) if reaching else max(pool)


# --------------------------------------------------------------------------- #
# Parameter packing (run ONCE, outside the jitted forward)
# --------------------------------------------------------------------------- #
def pack_params(params):
    """Concat/pad/cast the weights into kernel layout. Call once at load time."""
    D = params["wq"].shape[0]
    Dout = params["wf"].shape[1]
    Dp = _round_up(D, 128)
    Dout_pad = _round_up(Dout, 128)
    bf16 = jnp.bfloat16

    def pad_cols(w, cols):
        return jnp.pad(w, ((0, 0), (0, cols - w.shape[1])))

    def pad_rows(w, rows):
        return jnp.pad(w, ((0, rows - w.shape[0]), (0, 0)))

    # Each projection gets its own 128-aligned lane band (zero-padded tail).
    w_qkv = jnp.concatenate(
        [pad_cols(params["wq"], Dp),
         pad_cols(params["wk"], Dp),
         pad_cols(params["wv"], Dp)], axis=1).astype(bf16)          # (D, 3*Dp)
    w_o = pad_rows(pad_cols(params["wo"], Dp), Dp).astype(bf16)      # (Dp, Dp)
    w_f = pad_rows(pad_cols(params["wf"], Dout_pad), Dp).astype(bf16)  # (Dp, Dout_pad)

    L = max(3 * Dp, Dout_pad)

    def row(v):
        v = v.astype(jnp.float32).reshape(1, -1)
        return jnp.pad(v, ((0, 0), (0, L - v.shape[1])))

    b_qkv = jnp.concatenate(
        [pad_cols(params["bq"], Dp),
         pad_cols(params["bk"], Dp),
         pad_cols(params["bv"], Dp)], axis=1)                        # (1, 3*Dp)
    b_all = jnp.concatenate(
        [row(b_qkv), row(pad_cols(params["bo"], Dp)),
         row(pad_cols(params["bf"], Dout_pad))], axis=0)             # (3, L)

    return {"w_qkv": w_qkv, "w_o": w_o, "w_f": w_f, "b": b_all}


# --------------------------------------------------------------------------- #
# Forward wrapper
# --------------------------------------------------------------------------- #
def text_encoder_forward(x, packed, *, out_dim, single_buffer_weights=True):
    """x: (B, S, D) float32; packed: pack_params() output. Returns (B, out_dim)."""
    B, S, D = x.shape
    w_qkv, w_o, w_f, b_all = packed["w_qkv"], packed["w_o"], packed["w_f"], packed["b"]
    Dp = w_o.shape[0]
    Dout_pad = w_f.shape[1]
    L = b_all.shape[1]

    # Generation-aware VMEM budget (v5e/v6e: 128 MiB, v7x: 64 MiB per TC).
    cap = _vmem_capacity_bytes()
    budget = cap - max(8 << 20, cap // 8)
    wbytes = _weight_vmem_bytes(D, Dp, Dout_pad, L,
                                buffers=1 if single_buffer_weights else 2)
    fits = lambda bt: wbytes + _tile_vmem_bytes(bt, S, D, Dp, Dout_pad) <= budget
    B_TILE = _pick_b_tile(B, S, fits)
    grid = (B // B_TILE,)

    need = wbytes + _tile_vmem_bytes(B_TILE, S, D, Dp, Dout_pad)
    vmem_limit = int(min(cap - (4 << 20), max(need + (8 << 20), 32 << 20)))

    const2 = lambda b: (0, 0)  # noqa: E731  (weights/biases are grid-invariant)

    def weight_spec(shape):
        if single_buffer_weights:
            return pl.BlockSpec(shape, const2, pipeline_mode=pl.Buffered(1))
        return pl.BlockSpec(shape, const2)

    kernel = functools.partial(_text_encoder_kernel, true_d=D)

    out = pl.pallas_call(
        kernel,
        out_shape=jax.ShapeDtypeStruct((B, Dout_pad), jnp.float32),
        grid=grid,
        in_specs=[
            pl.BlockSpec((B_TILE, S, D), lambda b: (b, 0, 0)),   # x
            weight_spec((D, 3 * Dp)),                            # fused Wqkv
            weight_spec((Dp, Dp)),                               # Wo
            weight_spec((Dp, Dout_pad)),                         # Wf
            weight_spec((3, L)),                                 # packed biases
        ],
        out_specs=pl.BlockSpec((B_TILE, Dout_pad), lambda b: (b, 0)),
        compiler_params=pltpu.CompilerParams(
            dimension_semantics=("parallel",),
            vmem_limit_bytes=vmem_limit),
    )(x.astype(jnp.bfloat16), w_qkv, w_o, w_f, b_all)

    return out[:, :out_dim]


# --------------------------------------------------------------------------- #
# Parameters / reference
# --------------------------------------------------------------------------- #
def init_params(key, text_dim, output_dim):
    ks = jax.random.split(key, 6)

    def lin(k, fan_in, shape):
        return (jax.random.uniform(k, shape, jnp.float32, -1.0, 1.0)
                / math.sqrt(fan_in))

    return {
        "wq": lin(ks[0], text_dim, (text_dim, text_dim)),
        "bq": jnp.zeros((1, text_dim), jnp.float32),
        "wk": lin(ks[1], text_dim, (text_dim, text_dim)),
        "bk": jnp.zeros((1, text_dim), jnp.float32),
        "wv": lin(ks[2], text_dim, (text_dim, text_dim)),
        "bv": jnp.zeros((1, text_dim), jnp.float32),
        "wo": lin(ks[3], text_dim, (text_dim, text_dim)),
        "bo": jnp.full((1, text_dim), 0.01, jnp.float32),
        "wf": lin(ks[4], text_dim, (text_dim, output_dim)),
        "bf": jnp.full((1, output_dim), 0.01, jnp.float32),
    }


def _reference_forward(x, params):
    """Pure-JAX f32 reference of the same stand-in forward pass."""
    D = x.shape[-1]
    q = x @ params["wq"] + params["bq"]
    k = x @ params["wk"] + params["bk"]
    v = x @ params["wv"] + params["bv"]
    s = jnp.einsum("bqd,bkd->bqk", q, k) / math.sqrt(D)
    p = jax.nn.softmax(s, axis=-1)
    a = jnp.einsum("bqk,bkd->bqd", p, v)
    o = a @ params["wo"] + params["bo"]
    pooled = jnp.mean(o, axis=1)
    y = pooled @ params["wf"] + params["bf"]
    n = jnp.sqrt(jnp.sum(y * y, axis=1, keepdims=True))
    return y / jnp.maximum(n, 1e-12)


# --------------------------------------------------------------------------- #
# Main
# --------------------------------------------------------------------------- #
if __name__ == "__main__":
    B, S, TEXT_DIM, OUTPUT_DIM = 4, 8, 32, 16

    root = jax.random.PRNGKey(0)
    k_x, k_p = jax.random.split(root)
    x = jax.random.normal(k_x, (B, S, TEXT_DIM), jnp.float32)
    params = init_params(k_p, TEXT_DIM, OUTPUT_DIM)

    # One-time weight repack (hoisted out of the per-call forward).
    packed = jax.tree_util.tree_map(jax.block_until_ready, pack_params(params))

    fwd = jax.jit(text_encoder_forward,
                  static_argnames=("out_dim", "single_buffer_weights"))
    try:
        out = jax.block_until_ready(
            fwd(x, packed, out_dim=OUTPUT_DIM, single_buffer_weights=True))
    except Exception:
        # Fallback for JAX builds without BlockSpec pipeline_mode / pl.Buffered:
        # identical kernel, default double-buffered weight blocks.
        out = jax.block_until_ready(
            fwd(x, packed, out_dim=OUTPUT_DIM, single_buffer_weights=False))

    ref = jax.block_until_ready(_reference_forward(x, params))

    assert out.shape == (B, OUTPUT_DIM), out.shape
    assert bool(jnp.all(jnp.isfinite(out))), "non-finite output"
    norms = jnp.sqrt(jnp.sum(out * out, axis=1))
    assert jnp.allclose(norms, 1.0, atol=1e-3), norms
    max_err = float(jnp.max(jnp.abs(out - ref)))
    assert max_err < 5e-2, f"kernel vs reference mismatch: {max_err}"

    print("KERNEL_OK")
</pallas_src>

<mosaic_0001>
module attributes {stable_mosaic.version = 11 : i64} {
  func.func @_text_encoder_kernel(%arg0: i32, %arg1: memref<4x8x32xbf16, #tpu.memory_space<vmem>>, %arg2: memref<32x384xbf16, #tpu.memory_space<vmem>>, %arg3: memref<128x128xbf16, #tpu.memory_space<vmem>>, %arg4: memref<128x128xbf16, #tpu.memory_space<vmem>>, %arg5: memref<3x384xf32, #tpu.memory_space<vmem>>, %arg6: memref<4x128xf32, #tpu.memory_space<vmem>>) attributes {dimension_semantics = [#tpu.dimension_semantics<parallel>], iteration_bounds = array<i64: 1>, scalar_prefetch = 0 : i64, scratch_operands = 0 : i64, tpu.core_type = #tpu.core_type<tc>, window_params = [{transform_indices = @transform_0, window_bounds = array<i64: 4, 8, 32>}, {pipeline_mode = #tpu.pipeline_mode<synchronous>, transform_indices = @transform_1, window_bounds = array<i64: 32, 384>}, {pipeline_mode = #tpu.pipeline_mode<synchronous>, transform_indices = @transform_2, window_bounds = array<i64: 128, 128>}, {pipeline_mode = #tpu.pipeline_mode<synchronous>, transform_indices = @transform_3, window_bounds = array<i64: 128, 128>}, {pipeline_mode = #tpu.pipeline_mode<synchronous>, transform_indices = @transform_4, window_bounds = array<i64: 3, 384>}, {transform_indices = @transform_5, window_bounds = array<i64: 4, 128>}]} {
    %c0 = arith.constant 0 : index
    %c0_0 = arith.constant 0 : index
    %c0_1 = arith.constant 0 : index
    %0 = vector.load %arg1[%c0, %c0_0, %c0_1] : memref<4x8x32xbf16, #tpu.memory_space<vmem>>, vector<4x8x32xbf16>
    %1 = vector.shape_cast %0 : vector<4x8x32xbf16> to vector<32x32xbf16>
    %c0_2 = arith.constant 0 : index
    %c0_3 = arith.constant 0 : index
    %2 = vector.load %arg2[%c0_2, %c0_3] : memref<32x384xbf16, #tpu.memory_space<vmem>>, vector<32x384xbf16>
    %cst = arith.constant dense<0.000000e+00> : vector<32x384xf32>
    %3 = tpu.matmul %1, %2, %cst {dimension_numbers = #tpu.dot_dimension_numbers<[1], [0], [0], [1], [0, 0, 1, 1], [], []>} : vector<32x32xbf16>, vector<32x384xbf16>, vector<32x384xf32> -> vector<32x384xf32>
    %c0_4 = arith.constant 0 : index
    %c0_5 = arith.constant 0 : index
    %4 = vector.load %arg5[%c0_4, %c0_5] : memref<3x384xf32, #tpu.memory_space<vmem>>, vector<1x384xf32>
    %5 = vector.broadcast %4 : vector<1x384xf32> to vector<32x384xf32>
    %6 = arith.addf %3, %5 : vector<32x384xf32>
    %7 = vector.shape_cast %6 : vector<32x384xf32> to vector<4x8x384xf32>
    %8 = vector.extract_strided_slice %7 {offsets = [0, 0, 0], sizes = [4, 8, 128], strides = [1, 1, 1]} : vector<4x8x384xf32> to vector<4x8x128xf32>
    %9 = arith.truncf %8 : vector<4x8x128xf32> to vector<4x8x128xbf16>
    %10 = vector.extract_strided_slice %7 {offsets = [0, 0, 128], sizes = [4, 8, 128], strides = [1, 1, 1]} : vector<4x8x384xf32> to vector<4x8x128xf32>
    %11 = arith.truncf %10 : vector<4x8x128xf32> to vector<4x8x128xbf16>
    %12 = vector.extract_strided_slice %7 {offsets = [0, 0, 256], sizes = [4, 8, 128], strides = [1, 1, 1]} : vector<4x8x384xf32> to vector<4x8x128xf32>
    "tpu.trace_start"() <{level = 10 : i32, message = "bqd,bkd->bqk"}> : () -> ()
    %cst_6 = arith.constant dense<0.000000e+00> : vector<4x8x8xf32>
    %13 = tpu.matmul %9, %11, %cst_6 {dimension_numbers = #tpu.dot_dimension_numbers<[2], [2], [1], [1], [0, 0, 0, 1, 1, 1], [0], [0]>} : vector<4x8x128xbf16>, vector<4x8x128xbf16>, vector<4x8x8xf32> -> vector<4x8x8xf32>
    "tpu.trace_stop"() : () -> ()
    %cst_7 = arith.constant 0.176776692 : f32
    %14 = vector.broadcast %cst_7 : f32 to vector<4x8x8xf32>
    %15 = arith.mulf %13, %14 : vector<4x8x8xf32>
    %cst_8 = arith.constant dense<0xFF800000> : vector<4x8xf32>
    %16 = vector.multi_reduction <maximumf>, %15, %cst_8 [2] : vector<4x8x8xf32> to vector<4x8xf32>
    %17 = vector.shape_cast %16 : vector<4x8xf32> to vector<4x8x1xf32>
    %18 = vector.broadcast %17 : vector<4x8x1xf32> to vector<4x8x8xf32>
    %19 = arith.subf %15, %18 : vector<4x8x8xf32>
    %20 = math.exp %19 : vector<4x8x8xf32>
    %cst_9 = arith.constant dense<0.000000e+00> : vector<4x8xf32>
    %21 = vector.multi_reduction <add>, %20, %cst_9 [2] : vector<4x8x8xf32> to vector<4x8xf32>
    %22 = vector.shape_cast %21 : vector<4x8xf32> to vector<4x8x1xf32>
    %23 = tpu.reciprocal %22 {approx = true} : vector<4x8x1xf32> -> vector<4x8x1xf32>
    %24 = vector.broadcast %23 : vector<4x8x1xf32> to vector<4x8x8xf32>
    %25 = arith.mulf %20, %24 : vector<4x8x8xf32>
    %cst_10 = arith.constant dense<0.000000e+00> : vector<4x8xf32>
    %26 = vector.multi_reduction <add>, %25, %cst_10 [1] : vector<4x8x8xf32> to vector<4x8xf32>
    %cst_11 = arith.constant 8.000000e+00 : f32
    %27 = vector.broadcast %cst_11 : f32 to vector<4x8xf32>
    %28 = arith.divf %26, %27 : vector<4x8xf32>
    %29 = vector.shape_cast %28 : vector<4x8xf32> to vector<4x8x1xf32>
    %30 = vector.broadcast %29 : vector<4x8x1xf32> to vector<4x8x128xf32>
    %31 = arith.mulf %30, %12 : vector<4x8x128xf32>
    %cst_12 = arith.constant dense<0.000000e+00> : vector<4x128xf32>
    %32 = vector.multi_reduction <add>, %31, %cst_12 [1] : vector<4x8x128xf32> to vector<4x128xf32>
    %33 = arith.truncf %32 : vector<4x128xf32> to vector<4x128xbf16>
    %c0_13 = arith.constant 0 : index
    %c0_14 = arith.constant 0 : index
    %34 = vector.load %arg3[%c0_13, %c0_14] : memref<128x128xbf16, #tpu.memory_space<vmem>>, vector<128x128xbf16>
    %cst_15 = arith.constant dense<0.000000e+00> : vector<4x128xf32>
    %35 = tpu.matmul %33, %34, %cst_15 {dimension_numbers = #tpu.dot_dimension_numbers<[1], [0], [0], [1], [0, 0, 1, 1], [], []>} : vector<4x128xbf16>, vector<128x128xbf16>, vector<4x128xf32> -> vector<4x128xf32>
    %c1 = arith.constant 1 : index
    %c0_16 = arith.constant 0 : index
    %36 = vector.load %arg5[%c1, %c0_16] : memref<3x384xf32, #tpu.memory_space<vmem>>, vector<1x128xf32>
    %37 = vector.broadcast %36 : vector<1x128xf32> to vector<4x128xf32>
    %38 = arith.addf %35, %37 : vector<4x128xf32>
    %39 = arith.truncf %38 : vector<4x128xf32> to vector<4x128xbf16>
    %c0_17 = arith.constant 0 : index
    %c0_18 = arith.constant 0 : index
    %40 = vector.load %arg4[%c0_17, %c0_18] : memref<128x128xbf16, #tpu.memory_space<vmem>>, vector<128x128xbf16>
    %cst_19 = arith.constant dense<0.000000e+00> : vector<4x128xf32>
    %41 = tpu.matmul %39, %40, %cst_19 {dimension_numbers = #tpu.dot_dimension_numbers<[1], [0], [0], [1], [0, 0, 1, 1], [], []>} : vector<4x128xbf16>, vector<128x128xbf16>, vector<4x128xf32> -> vector<4x128xf32>
    %c2 = arith.constant 2 : index
    %c0_20 = arith.constant 0 : index
    %42 = vector.load %arg5[%c2, %c0_20] : memref<3x384xf32, #tpu.memory_space<vmem>>, vector<1x128xf32>
    %43 = vector.broadcast %42 : vector<1x128xf32> to vector<4x128xf32>
    %44 = arith.addf %41, %43 : vector<4x128xf32>
    %45 = arith.mulf %44, %44 : vector<4x128xf32>
    %cst_21 = arith.constant dense<0.000000e+00> : vector<4xf32>
    %46 = vector.multi_reduction <add>, %45, %cst_21 [1] : vector<4x128xf32> to vector<4xf32>
    %47 = vector.shape_cast %46 : vector<4xf32> to vector<4x1xf32>
    %cst_22 = arith.constant 1.000000e-24 : f32
    %48 = vector.broadcast %cst_22 : f32 to vector<4x1xf32>
    %49 = arith.maximumf %47, %48 : vector<4x1xf32>
    %50 = math.rsqrt %49 : vector<4x1xf32>
    %51 = vector.broadcast %50 : vector<4x1xf32> to vector<4x128xf32>
    %52 = arith.mulf %44, %51 : vector<4x128xf32>
    %c0_23 = arith.constant 0 : index
    %c0_24 = arith.constant 0 : index
    %53 = vector.load %arg6[%c0_23, %c0_24] : memref<4x128xf32, #tpu.memory_space<vmem>>, vector<4x128xf32>
    tpu.vector_store %arg6[%c0_23, %c0_24], %52 {strides = array<i32>} : memref<4x128xf32, #tpu.memory_space<vmem>>, vector<4x128xf32>,
    return
  }
  func.func @transform_0(%arg0: i32) -> (i32, i32, i32) {
    %c0_i32 = arith.constant 0 : i32
    %c0_i32_0 = arith.constant 0 : i32
    %c0_i32_1 = arith.constant 0 : i32
    return %arg0, %c0_i32, %c0_i32_0 : i32, i32, i32
  }
  func.func @transform_1(%arg0: i32) -> (i32, i32) {
    %c0_i32 = arith.constant 0 : i32
    %c0_i32_0 = arith.constant 0 : i32
    %c0_i32_1 = arith.constant 0 : i32
    return %c0_i32, %c0_i32_0 : i32, i32
  }
  func.func @transform_2(%arg0: i32) -> (i32, i32) {
    %c0_i32 = arith.constant 0 : i32
    %c0_i32_0 = arith.constant 0 : i32
    %c0_i32_1 = arith.constant 0 : i32
    return %c0_i32, %c0_i32_0 : i32, i32
  }
  func.func @transform_3(%arg0: i32) -> (i32, i32) {
    %c0_i32 = arith.constant 0 : i32
    %c0_i32_0 = arith.constant 0 : i32
    %c0_i32_1 = arith.constant 0 : i32
    return %c0_i32, %c0_i32_0 : i32, i32
  }
  func.func @transform_4(%arg0: i32) -> (i32, i32) {
    %c0_i32 = arith.constant 0 : i32
    %c0_i32_0 = arith.constant 0 : i32
    %c0_i32_1 = arith.constant 0 : i32
    return %c0_i32, %c0_i32_0 : i32, i32
  }
  func.func @transform_5(%arg0: i32) -> (i32, i32) {
    %c0_i32 = arith.constant 0 : i32
    %c0_i32_0 = arith.constant 0 : i32
    return %arg0, %c0_i32 : i32, i32
  }
}

module attributes {stable_mosaic.version = 11 : i64} {
  func.func @_text_encoder_kernel(%arg0: i32, %arg1: memref<4x8x32xbf16, #tpu.memory_space<vmem>>, %arg2: memref<32x384xbf16, #tpu.memory_space<vmem>>, %arg3: memref<128x128xbf16, #tpu.memory_space<vmem>>, %arg4: memref<128x128xbf16, #tpu.memory_space<vmem>>, %arg5: memref<3x384xf32, #tpu.memory_space<vmem>>, %arg6: memref<4x128xf32, #tpu.memory_space<vmem>>) attributes {dimension_semantics = [#tpu.dimension_semantics<parallel>], iteration_bounds = array<i64: 1>, scalar_prefetch = 0 : i64, scratch_operands = 0 : i64, tpu.core_type = #tpu.core_type<tc>, window_params = [{transform_indices = @transform_0, window_bounds = array<i64: 4, 8, 32>}, {pipeline_mode = #tpu.pipeline_mode<synchronous>, transform_indices = @transform_1, window_bounds = array<i64: 32, 384>}, {pipeline_mode = #tpu.pipeline_mode<synchronous>, transform_indices = @transform_2, window_bounds = array<i64: 128, 128>}, {pipeline_mode = #tpu.pipeline_mode<synchronous>, transform_indices = @transform_3, window_bounds = array<i64: 128, 128>}, {pipeline_mode = #tpu.pipeline_mode<synchronous>, transform_indices = @transform_4, window_bounds = array<i64: 3, 384>}, {transform_indices = @transform_5, window_bounds = array<i64: 4, 128>}]} {
    %c0 = arith.constant 0 : index
    %c0_0 = arith.constant 0 : index
    %c0_1 = arith.constant 0 : index
    %0 = vector.load %arg1[%c0, %c0_0, %c0_1] : memref<4x8x32xbf16, #tpu.memory_space<vmem>>, vector<4x8x32xbf16>
    %1 = vector.shape_cast %0 : vector<4x8x32xbf16> to vector<32x32xbf16>
    %c0_2 = arith.constant 0 : index
    %c0_3 = arith.constant 0 : index
    %2 = vector.load %arg2[%c0_2, %c0_3] : memref<32x384xbf16, #tpu.memory_space<vmem>>, vector<32x384xbf16>
    %cst = arith.constant dense<0.000000e+00> : vector<32x384xf32>
    %3 = tpu.matmul %1, %2, %cst {dimension_numbers = #tpu.dot_dimension_numbers<[1], [0], [0], [1], [0, 0, 1, 1], [], []>} : vector<32x32xbf16>, vector<32x384xbf16>, vector<32x384xf32> -> vector<32x384xf32>
    %c0_4 = arith.constant 0 : index
    %c0_5 = arith.constant 0 : index
    %4 = vector.load %arg5[%c0_4, %c0_5] : memref<3x384xf32, #tpu.memory_space<vmem>>, vector<1x384xf32>
    %5 = vector.broadcast %4 : vector<1x384xf32> to vector<32x384xf32>
    %6 = arith.addf %3, %5 : vector<32x384xf32>
    %7 = vector.shape_cast %6 : vector<32x384xf32> to vector<4x8x384xf32>
    %8 = vector.extract_strided_slice %7 {offsets = [0, 0, 0], sizes = [4, 8, 128], strides = [1, 1, 1]} : vector<4x8x384xf32> to vector<4x8x128xf32>
    %9 = arith.truncf %8 : vector<4x8x128xf32> to vector<4x8x128xbf16>
    %10 = vector.extract_strided_slice %7 {offsets = [0, 0, 128], sizes = [4, 8, 128], strides = [1, 1, 1]} : vector<4x8x384xf32> to vector<4x8x128xf32>
    %11 = arith.truncf %10 : vector<4x8x128xf32> to vector<4x8x128xbf16>
    %12 = vector.extract_strided_slice %7 {offsets = [0, 0, 256], sizes = [4, 8, 128], strides = [1, 1, 1]} : vector<4x8x384xf32> to vector<4x8x128xf32>
    "tpu.trace_start"() <{level = 10 : i32, message = "bqd,bkd->bqk"}> : () -> ()
    %cst_6 = arith.constant dense<0.000000e+00> : vector<4x8x8xf32>
    %13 = tpu.matmul %9, %11, %cst_6 {dimension_numbers = #tpu.dot_dimension_numbers<[2], [2], [1], [1], [0, 0, 0, 1, 1, 1], [0], [0]>} : vector<4x8x128xbf16>, vector<4x8x128xbf16>, vector<4x8x8xf32> -> vector<4x8x8xf32>
    "tpu.trace_stop"() : () -> ()
    %cst_7 = arith.constant 0.176776692 : f32
    %14 = vector.broadcast %cst_7 : f32 to vector<4x8x8xf32>
    %15 = arith.mulf %13, %14 : vector<4x8x8xf32>
    %cst_8 = arith.constant dense<0xFF800000> : vector<4x8xf32>
    %16 = vector.multi_reduction <maximumf>, %15, %cst_8 [2] : vector<4x8x8xf32> to vector<4x8xf32>
    %17 = vector.shape_cast %16 : vector<4x8xf32> to vector<4x8x1xf32>
    %18 = vector.broadcast %17 : vector<4x8x1xf32> to vector<4x8x8xf32>
    %19 = arith.subf %15, %18 : vector<4x8x8xf32>
    %20 = math.exp %19 : vector<4x8x8xf32>
    %cst_9 = arith.constant dense<0.000000e+00> : vector<4x8xf32>
    %21 = vector.multi_reduction <add>, %20, %cst_9 [2] : vector<4x8x8xf32> to vector<4x8xf32>
    %22 = vector.shape_cast %21 : vector<4x8xf32> to vector<4x8x1xf32>
    %23 = tpu.reciprocal %22 {approx = true} : vector<4x8x1xf32> -> vector<4x8x1xf32>
    %24 = vector.broadcast %23 : vector<4x8x1xf32> to vector<4x8x8xf32>
    %25 = arith.mulf %20, %24 : vector<4x8x8xf32>
    %cst_10 = arith.constant dense<0.000000e+00> : vector<4x8xf32>
    %26 = vector.multi_reduction <add>, %25, %cst_10 [1] : vector<4x8x8xf32> to vector<4x8xf32>
    %cst_11 = arith.constant 8.000000e+00 : f32
    %27 = vector.broadcast %cst_11 : f32 to vector<4x8xf32>
    %28 = arith.divf %26, %27 : vector<4x8xf32>
    %29 = vector.shape_cast %28 : vector<4x8xf32> to vector<4x8x1xf32>
    %30 = vector.broadcast %29 : vector<4x8x1xf32> to vector<4x8x128xf32>
    %31 = arith.mulf %30, %12 : vector<4x8x128xf32>
    %cst_12 = arith.constant dense<0.000000e+00> : vector<4x128xf32>
    %32 = vector.multi_reduction <add>, %31, %cst_12 [1] : vector<4x8x128xf32> to vector<4x128xf32>
    %33 = arith.truncf %32 : vector<4x128xf32> to vector<4x128xbf16>
    %c0_13 = arith.constant 0 : index
    %c0_14 = arith.constant 0 : index
    %34 = vector.load %arg3[%c0_13, %c0_14] : memref<128x128xbf16, #tpu.memory_space<vmem>>, vector<128x128xbf16>
    %cst_15 = arith.constant dense<0.000000e+00> : vector<4x128xf32>
    %35 = tpu.matmul %33, %34, %cst_15 {dimension_numbers = #tpu.dot_dimension_numbers<[1], [0], [0], [1], [0, 0, 1, 1], [], []>} : vector<4x128xbf16>, vector<128x128xbf16>, vector<4x128xf32> -> vector<4x128xf32>
    %c1 = arith.constant 1 : index
    %c0_16 = arith.constant 0 : index
    %36 = vector.load %arg5[%c1, %c0_16] : memref<3x384xf32, #tpu.memory_space<vmem>>, vector<1x128xf32>
    %37 = vector.broadcast %36 : vector<1x128xf32> to vector<4x128xf32>
    %38 = arith.addf %35, %37 : vector<4x128xf32>
    %39 = arith.truncf %38 : vector<4x128xf32> to vector<4x128xbf16>
    %c0_17 = arith.constant 0 : index
    %c0_18 = arith.constant 0 : index
    %40 = vector.load %arg4[%c0_17, %c0_18] : memref<128x128xbf16, #tpu.memory_space<vmem>>, vector<128x128xbf16>
    %cst_19 = arith.constant dense<0.000000e+00> : vector<4x128xf32>
    %41 = tpu.matmul %39, %40, %cst_19 {dimension_numbers = #tpu.dot_dimension_numbers<[1], [0], [0], [1], [0, 0, 1, 1], [], []>} : vector<4x128xbf16>, vector<128x128xbf16>, vector<4x128xf32> -> vector<4x128xf32>
    %c2 = arith.constant 2 : index
    %c0_20 = arith.constant 0 : index
    %42 = vector.load %arg5[%c2, %c0_20] : memref<3x384xf32, #tpu.memory_space<vmem>>, vector<1x128xf32>
    %43 = vector.broadcast %42 : vector<1x128xf32> to vector<4x128xf32>
    %44 = arith.addf %41, %43 : vector<4x128xf32>
    %45 = arith.mulf %44, %44 : vector<4x128xf32>
    %cst_21 = arith.constant dense<0.000000e+00> : vector<4xf32>
    %46 = vector.multi_reduction <add>, %45, %cst_21 [1] : vector<4x128xf32> to vector<4xf32>
    %47 = vector.shape_cast %46 : vector<4xf32> to vector<4x1xf32>
    %cst_22 = arith.constant 1.000000e-24 : f32
    %48 = vector.broadcast %cst_22 : f32 to vector<4x1xf32>
    %49 = arith.maximumf %47, %48 : vector<4x1xf32>
    %50 = math.rsqrt %49 : vector<4x1xf32>
    %51 = vector.broadcast %50 : vector<4x1xf32> to vector<4x128xf32>
    %52 = arith.mulf %44, %51 : vector<4x128xf32>
    %c0_23 = arith.constant 0 : index
    %c0_24 = arith.constant 0 : index
    %53 = vector.load %arg6[%c0_23, %c0_24] : memref<4x128xf32, #tpu.memory_space<vmem>>, vector<4x128xf32>
    tpu.vector_store %arg6[%c0_23, %c0_24], %52 {strides = array<i32>} : memref<4x128xf32, #tpu.memory_space<vmem>>, vector<4x128xf32>,
    return
  }
  func.func @transform_0(%arg0: i32) -> (i32, i32, i32) {
    %c0_i32 = arith.constant 0 : i32
    %c0_i32_0 = arith.constant 0 : i32
    %c0_i32_1 = arith.constant 0 : i32
    return %arg0, %c0_i32, %c0_i32_0 : i32, i32, i32
  }
  func.func @transform_1(%arg0: i32) -> (i32, i32) {
    %c0_i32 = arith.constant 0 : i32
    %c0_i32_0 = arith.constant 0 : i32
    %c0_i32_1 = arith.constant 0 : i32
    return %c0_i32, %c0_i32_0 : i32, i32
  }
  func.func @transform_2(%arg0: i32) -> (i32, i32) {
    %c0_i32 = arith.constant 0 : i32
    %c0_i32_0 = arith.constant 0 : i32
    %c0_i32_1 = arith.constant 0 : i32
    return %c0_i32, %c0_i32_0 : i32, i32
  }
  func.func @transform_3(%arg0: i32) -> (i32, i32) {
    %c0_i32 = arith.constant 0 : i32
    %c0_i32_0 = arith.constant 0 : i32
    %c0_i32_1 = arith.constant 0 : i32
    return %c0_i32, %c0_i32_0 : i32, i32
  }
  func.func @transform_4(%arg0: i32) -> (i32, i32) {
    %c0_i32 = arith.constant 0 : i32
    %c0_i32_0 = arith.constant 0 : i32
    %c0_i32_1 = arith.constant 0 : i32
    return %c0_i32, %c0_i32_0 : i32, i32
  }
  func.func @transform_5(%arg0: i32) -> (i32, i32) {
    %c0_i32 = arith.constant 0 : i32
    %c0_i32_0 = arith.constant 0 : i32
    return %arg0, %c0_i32 : i32, i32
  }
}

</mosaic_0001>

<bundles_post_ra>
// kernel: text_encoder_forward.1
= control target key start
LH: loop header
LB: loop body
LE: loop exit
PB: predicated region body
PF: predicated region fallthrough
CT: control target
= control target key end

     0   :  { %10 = vsyncpa [#allocation3], 0  ;;  %s1207_s0 = inlined_call_operand.vmem [shape: bf16[4,8,32], index: 0, kind: input, shape index: {}]   ;;  %s1208_s1 = inlined_call_operand.vmem [shape: bf16[32,384], index: 1, kind: input, shape index: {}]   ;;  %s1209_s2 = inlined_call_operand.hbm [shape: bf16[128,128], index: 2, kind: input, shape index: {}]   ;;  %s1210_s3 = inlined_call_operand.hbm [shape: bf16[128,128], index: 3, kind: input, shape index: {}]   ;;  %s1211_s4 = inlined_call_operand.hbm [shape: f32[3,384], index: 4, kind: input, shape index: {}]   ;;  %s1212_s5 = inlined_call_operand.hbm [shape: f32[4,128], index: 5, kind: output, shape index: {}]  }
   0x1   :  { %11 = vsyncpa [#allocation6], 0 }
   0x2   :  { %12 = vsyncpa [#allocation4], 0  ;;  %s1066_s18 = smov [#allocation5]   ;;  %s1067_s20 = smov [#allocation2]  }
   0x3   :  { %s34_s19 = sshll.u32 %s1066_s18, 4  ;;  %s22_s21 = sshll.u32 %s1067_s20, 4  ;;  %s35_s19 = int_to_ptr.vmem [resolvable:$true] %s34_s19  ;;  %s23_s21 = int_to_ptr.vmem [resolvable:$true] %s22_s21 }
   0x4   :  { %s988_s22 = scalar_lea.vmem %s35_s19, 1024  ;;  %p993_p1 = scmp.lt.s32.totalorder %s35_s19, %s35_s19 }
   0x5   :  { %p989_p0 = scmp.ne.s32.totalorder %s35_s19, %s988_s22  ;;  %p994_p2 = scmp.lt.s32.totalorder %s988_s22, %s988_s22 }
   0x7   :  { %p995_p3 = por %p994_p2, %p993_p1 }
   0x9   :  { %p996_p4 = pnand %p995_p3, %p989_p0 }
   0xb   :  { %999 = shalt.err (!%p996_p4)
}
   0xc   :  { %s1068_s23 = smov 64   ;;  %s1069_s24 = smov 4  }
   0xd   :  { %40 = dma.hbm_to_vmem [thread:$0]  %s1210_s3, 1024, %s35_s19, [#allocation6], %s1068_s23, %s1068_s23, %s1069_s24  }
   0xe   :  { %s1008_s27 = scalar_lea.vmem %s23_s21, 1024  ;;  %p1013_p6 = scmp.lt.s32.totalorder %s23_s21, %s23_s21 }
   0xf   :  { %p1009_p5 = scmp.ne.s32.totalorder %s23_s21, %s1008_s27  ;;  %p1014_p7 = scmp.lt.s32.totalorder %s1008_s27, %s1008_s27 }
  0x11   :  { %p1015_p8 = por %p1014_p7, %p1013_p6 }
  0x13   :  { %p1016_p9 = pnand %p1015_p8, %p1009_p5 }
  0x15   :  { %1019 = shalt.err (!%p1016_p9)
}
  0x16   :  { %28 = dma.hbm_to_vmem [thread:$0]  %s1209_s2, 1024, %s23_s21, [#allocation3], %s1068_s23, %s1068_s23, %s1069_s24  }
  0x17   :  { %s1070_s30 = smov [#allocation7]  }
  0x18   :  { %s47_s6 = sshll.u32 %s1070_s30, 4  ;;  %s48_s6 = int_to_ptr.vmem [resolvable:$true] %s47_s6 }
  0x19   :  { %s1028_s7 = scalar_lea.vmem %s48_s6, 192  ;;  %p1033_p11 = scmp.lt.s32.totalorder %s48_s6, %s48_s6 }
  0x1a   :  { %p1029_p10 = scmp.ne.s32.totalorder %s48_s6, %s1028_s7  ;;  %p1034_p12 = scmp.lt.s32.totalorder %s1028_s7, %s1028_s7 }
  0x1c   :  { %p1035_p13 = por %p1034_p12, %p1033_p11 }
  0x1e   :  { %p1036_p0 = pnand %p1035_p13, %p1029_p10 }
  0x20   :  { %1039 = shalt.err (!%p1036_p0)
}
  0x21   :  { %50 = dma.hbm_to_vmem [thread:$0]  %s1211_s4, 192, %s48_s6, [#allocation6]  }
  0x22   :  { %1060 = dma.done.wait [#allocation3], 1024  }
  0x23   :  { %1061 = vsyncadd [#allocation3], 4294966272 }
  0x24   :  { %1062 = dma.done.wait [#allocation6], 1216  }
  0x25   :  { %1063 = vsyncadd [#allocation6], 4294966080  ;;  %v1071_v0 = vmov 0   ;;  %v936_v1 = vld [vmem:[%s1208_s1 + $0x1c] ss:$12 sps:$4 sm:$0xff]   ;;  %v942_v5 = vld [vmem:[%s1207_s0] sm:$0xff]   ;;  %v75_v10 = vlaneseq }
  0x26   :  { %171 = vmatprep.mubr.bf16.mxu0 %v1071_v0  ;;  %v938_v2 = vld [vmem:[%s1208_s1 + $0x18] ss:$12 sps:$4 sm:$0xff]   ;;  %151 = vmatprep.subr.bf16.mxu0 %v936_v1  ;;  %v941_v4 = vld [vmem:[%s1208_s1] ss:$12 sps:$4 sm:$0xff]   ;;  %vm132_vm0 = vcmask 261120   ;;  %v1072_v9 = vmov 0.0  }
  0x27   :  { %v939_v3 = vld [vmem:[%s1208_s1 + $0x4] ss:$12 sps:$4 sm:$0xff]   ;;  %152 = vmatpush1.bf16.msra.mxu0 %v938_v2  ;;  %v944_v6 = vld [vmem:[%s1208_s1 + $0x20] ss:$12 sps:$4 sm:$0xff]   ;;  %859 = vmatprep.mubr.msk.bf16.mxu1 %vm132_vm0, %v942_v5  ;;  %v945_v8 = vld [vmem:[%s1208_s1 + $0x8] ss:$12 sps:$4 sm:$0xff]  }
  0x28   :  { %153 = vmatprep.subr.bf16.mxu0 %v939_v3  ;;  %855 = vmatprep.subr.bf16.mxu1 %v944_v6  ;;  %v943_v7 = vld [vmem:[%s1207_s0 + $0x8] sm:$0xff]   ;;  %vm1073_vm1 = vmmov 0   ;;  %v1144_v11 = vshrl.u32 %v75_v10, 7  ;;  %v1147_v13 = vld [vmem:[#allocation7] ss:$4 sm:$0x7] }
  0x29   :  { %856 = vmatpush3.bf16.msra.mxu1 %v944_v6  ;;  %vm413_vm2 = vcmask 64512   ;;  %vm564_vm3 = vcmask 1041409   ;;  %vm566_vm4 = vcmask 1042434   ;;  %vm568_vm5 = vcmask 1043459   ;;  %s1074_s0 = smov [#allocation8]  }
  0x2a   :  { %857 = vmatprep.subr.bf16.mxu1 %v945_v8  ;;  %v81_v12 = vsub.s32 1, %v1144_v11  ;;  %v77_v15 = vsub.s32 0, %v1144_v11  ;;  %vm771_vm6 = vcmask 1043456   ;;  %s785_s1 = sshll.u32 %s1074_s0, 4  ;;  %s786_s1 = int_to_ptr.vmem [resolvable:$true] %s785_s1 }
  0x2b   :  { %154 = vmatpush1.bf16.msra.mxu0 %v941_v4  ;;  %s1040_s23 = scalar_lea.vmem %s786_s1, 64  ;;  %p1045_p2 = scmp.lt.s32.totalorder %s786_s1, %s786_s1 }
  0x2c   :  { %869 = vmatprep.subr.bf16.mxu0 %v1072_v9  ;;  %v82_v14 = vrot.slane %v1147_v13, %v81_v12  ;;  %v78_v19 = vrot.slane %v1147_v13, %v77_v15  ;;  %p1041_p1 = scmp.ne.s32.totalorder %s786_s1, %s1040_s23  ;;  %p1046_p3 = scmp.lt.s32.totalorder %s1040_s23, %s1040_s23 }
  0x2d   :  { %858 = vmatpush3.bf16.msra.mxu1 %v945_v8 }
  0x2e   :  { %803 = vmatmul.mubr.msk.bf16.vlgmr.msra.gmra.mxu0 %vm132_vm0, %v942_v5  ;;  %863 = vmatprep.subr.bf16.mxu1 %v1072_v9  ;;  %p1047_p4 = por %p1046_p3, %p1045_p2 }
  0x2f   :  { %181 = vmatprep.mubr.bf16.mxu0 %v1071_v0 }
  0x30   :  { %860 = vmatmul.mubr.msk.bf16.vlgmr.msra.gmra.mxu1 %vm132_vm0, %v943_v7  ;;  %p1048_p5 = pnand %p1047_p4, %p1041_p1 }
  0x31   :  { %865 = vmatprep.mubr.msk.bf16.mxu1 %vm1073_vm1, %v1072_v9 }
  0x36   :  { %804 = vmatmul.mubr.msk.bf16.gmra.mxu0 %vm132_vm0, %v943_v7 }
  0x37   :  { %871 = vmatprep.mubr.msk.bf16.mxu0 %vm1073_vm1, %v1072_v9 }
  0xee   :  { %v173_v16 = vpop.f32.mrf.mxu0 }
  0xef   :  { %v174_v24 = vadd.f32 %v173_v16, %v78_v19 }
  0xf0   :  { %v175_v17 = vpop.f32.mrf.mxu0  ;;  %v1164_v41 = vpop.f32.mrf.mxu1 }
  0xf1   :  { %v176_v18 = vadd.f32 %v175_v17, %v82_v14  ;;  %v241_v29 = vpack.c.bf16 %v174_v24, %v174_v24 }
  0xf2   :  { %v177_v20 = vpop.f32.mrf.mxu0  ;;  %v1166_v42 = vpop.f32.mrf.mxu1 }
  0xf3   :  { %v245_v21 = vpack.c.bf16 %v176_v18, %v176_v18  ;;  %v178_v30 = vadd.f32 %v177_v20, %v78_v19 }
  0xf4   :  { %v179_v22 = vpop.f32.mrf.mxu0  ;;  %v1168_v43 = vpop.f32.mrf.mxu1 }
  0xf5   :  { %v180_v23 = vadd.f32 %v179_v22, %v82_v14  ;;  %864 = vmatpush3.bf16.xpose.msra.mxu1 %v245_v21  ;;  %v242_v35 = vpack.c.bf16 %v178_v30, %v178_v30 }
  0xf6   :  { %v183_v25 = vpop.f32.mrf.mxu0  ;;  %875 = vmatprep.subr.bf16.mxu1 %v1072_v9  ;;  %v1170_v44 = vpop.f32.mrf.mxu1 }
  0xf7   :  { %v246_v26 = vpack.c.bf16 %v180_v23, %v180_v23  ;;  %v184_v36 = vadd.f32 %v183_v25, %v78_v19 }
  0xf8   :  { %v185_v27 = vpop.f32.mrf.mxu0 }
  0xf9   :  { %v186_v28 = vadd.f32 %v185_v27, %v82_v14  ;;  %870 = vmatpush3.bf16.xpose.msra.mxu0 %v246_v26  ;;  %v243_v38 = vpack.c.bf16 %v184_v36, %v184_v36 }
  0xfa   :  { %v187_v31 = vpop.f32.mrf.mxu0  ;;  %881 = vmatprep.subr.bf16.mxu0 %v1072_v9 }
  0xfb   :  { %v247_v32 = vpack.c.bf16 %v186_v28, %v186_v28  ;;  %v188_v39 = vadd.f32 %v187_v31, %v78_v19 }
  0xfc   :  { %v189_v33 = vpop.f32.mrf.mxu0  ;;  %866 = vmatmul.mubr.bf16.vlgmr.msra.gmra.mxu1 %v241_v29 }
  0xfd   :  { %v190_v34 = vadd.f32 %v189_v33, %v82_v14  ;;  %876 = vmatpush3.bf16.xpose.msra.mxu1 %v247_v32  ;;  %877 = vmatprep.mubr.msk.bf16.mxu1 %vm1073_vm1, %v1072_v9  ;;  %v244_v40 = vpack.c.bf16 %v188_v39, %v188_v39 }
  0xfe   :  { %887 = vmatprep.subr.bf16.mxu1 %v1072_v9 }
  0xff   :  { %v248_v37 = vpack.c.bf16 %v190_v34, %v190_v34 }
 0x100   :  { %872 = vmatmul.mubr.bf16.vlgmr.msra.gmra.mxu0 %v242_v35 }
 0x101   :  { %882 = vmatpush3.bf16.xpose.msra.mxu0 %v248_v37  ;;  %883 = vmatprep.mubr.msk.bf16.mxu0 %vm1073_vm1, %v1072_v9 }
 0x102   :  { %907 = vmatprep.subr.bf16.mxu0 %v1072_v9 }
 0x104   :  { %878 = vmatmul.mubr.bf16.vlgmr.msra.gmra.mxu1 %v243_v38  ;;  %v946_v38 = vld [vmem:[#allocation2 + $0x38] sm:$0xff]  }
 0x105   :  { %903 = vmatprep.mubr.msk.bf16.mxu1 %vm1073_vm1, %v1072_v9  ;;  %888 = vmatpush3.bf16.msra.mxu1 %v946_v38 }
 0x106   :  { %889 = vmatprep.subr.bf16.mxu1 %v1072_v9 }
 0x108   :  { %884 = vmatmul.mubr.bf16.vlgmr.msra.gmra.mxu0 %v244_v40 }
 0x109   :  { %923 = vmatprep.mubr.msk.bf16.mxu0 %vm1073_vm1, %v1072_v9 }
 0x1bc   :  { %v283_v45 = vpop.f32.mrf.mxu1 }
 0x1bd   :  { %v409_v46 = vmul.f32 0.17677669, %v283_v45 }
 0x1be   :  { %v867_v47 = vpop.f32.mrf.mxu1 }
 0x1bf   :  { %v414_v48 = vsel %vm413_vm2, %v409_v46, -inf }
 0x1c0   :  { %v323_v49 = vpop.f32.mrf.mxu0  ;;  %415 = vmax.xlane.f32.xlu0 %v414_v48  ;;  %v286_v50 = vpop.f32.mrf.mxu1 }
 0x1c1   :  { %v410_v51 = vmul.f32 0.17677669, %v323_v49  ;;  %v947_v49 = vld [vmem:[#allocation2 + $0x30] sm:$0xff]  }
 0x1c2   :  { %v868_v52 = vpop.f32.mrf.mxu1  ;;  %v873_v53 = vpop.f32.mrf.mxu0  ;;  %890 = vmatpush3.bf16.msra.mxu1 %v947_v49 }
 0x1c3   :  { %v417_v54 = vsel %vm413_vm2, %v410_v51, -inf  ;;  %891 = vmatprep.subr.bf16.mxu1 %v1072_v9 }
 0x1c4   :  { %v326_v55 = vpop.f32.mrf.mxu0  ;;  %418 = vmax.xlane.f32.xlu0 %v417_v54  ;;  %v363_v56 = vpop.f32.mrf.mxu1 }
 0x1c5   :  { %v411_v57 = vmul.f32 0.17677669, %v363_v56 }
 0x1c6   :  { %v874_v58 = vpop.f32.mrf.mxu0  ;;  %v879_v59 = vpop.f32.mrf.mxu1 }
 0x1c7   :  { %v420_v60 = vsel %vm413_vm2, %v411_v57, -inf  ;;  %v948_v58 = vld [vmem:[#allocation2 + $0x28] sm:$0xff]  }
 0x1c8   :  { %v403_v61 = vpop.f32.mrf.mxu0  ;;  %421 = vmax.xlane.f32.xlu1 %v420_v60  ;;  %v366_v62 = vpop.f32.mrf.mxu1  ;;  %892 = vmatpush3.bf16.msra.mxu1 %v948_v58 }
 0x1c9   :  { %v412_v63 = vmul.f32 0.17677669, %v403_v61  ;;  %893 = vmatprep.subr.bf16.mxu1 %v1072_v9 }
 0x1ca   :  { %v880_v0 = vpop.f32.mrf.mxu1  ;;  %v885_v1 = vpop.f32.mrf.mxu0 }
 0x1cb   :  { %v423_v2 = vsel %vm413_vm2, %v412_v63, -inf }
 0x1cc   :  { %v406_v3 = vpop.f32.mrf.mxu0  ;;  %424 = vmax.xlane.f32.xlu1 %v423_v2 }
 0x1cd   :  { %v949_v3 = vld [vmem:[#allocation2 + $0x20] sm:$0xff]  }
 0x1ce   :  { %v886_v4 = vpop.f32.mrf.mxu0  ;;  %894 = vmatpush3.bf16.msra.mxu1 %v949_v3 }
 0x1cf   :  { %895 = vmatprep.subr.bf16.mxu1 %v1072_v9 }
 0x249   :  { %v416_v5 = vpop.xlane.xlu0 %415 }
 0x24a   :  { %v426_v6 = vsub.f32 %v409_v46, %v416_v5 }
 0x24c   :  { %v430_v7 = vmul.f32 1.442695, %v426_v6 }
 0x24d   :  { %v419_v8 = vpop.xlane.xlu0 %418 }
 0x24e   :  { %962 = vpow2.f32 %v430_v7  ;;  %v427_v10 = vsub.f32 %v410_v51, %v419_v8 }
 0x250   :  { %v432_v12 = vmul.f32 1.442695, %v427_v10 }
 0x251   :  { %v422_v14 = vpop.xlane.xlu1 %421 }
 0x252   :  { %964 = vpow2.f32 %v432_v12  ;;  %v428_v15 = vsub.f32 %v411_v57, %v422_v14  ;;  %v950_v12 = vld [vmem:[#allocation2 + $0x18] sm:$0xff]  }
 0x253   :  { %896 = vmatpush3.bf16.msra.mxu1 %v950_v12 }
 0x254   :  { %v434_v16 = vmul.f32 1.442695, %v428_v15  ;;  %897 = vmatprep.subr.bf16.mxu1 %v1072_v9 }
 0x255   :  { %v425_v17 = vpop.xlane.xlu1 %424 }
 0x256   :  { %966 = vpow2.f32 %v434_v16  ;;  %v429_v18 = vsub.f32 %v412_v63, %v425_v17 }
 0x258   :  { %v436_v19 = vmul.f32 1.442695, %v429_v18  ;;  %v951_v18 = vld [vmem:[#allocation2 + $0x10] sm:$0xff]  }
 0x259   :  { %898 = vmatpush3.bf16.msra.mxu1 %v951_v18 }
 0x25a   :  { %968 = vpow2.f32 %v436_v19  ;;  %899 = vmatprep.subr.bf16.mxu1 %v1072_v9 }
 0x25b   :  { %v963_v20 = vpop.eup %962 }
 0x25c   :  { %v438_v21 = vsel %vm413_vm2, %v963_v20, 0.0 }
 0x25d   :  { %439 = vadd.xlane.f32.xlu0 %v438_v21  ;;  %v952_v21 = vld [vmem:[#allocation2 + $0x8] sm:$0xff]  }
 0x25e   :  { %900 = vmatpush3.bf16.msra.mxu1 %v952_v21 }
 0x25f   :  { %v965_v22 = vpop.eup %964  ;;  %901 = vmatprep.subr.bf16.mxu1 %v1072_v9 }
 0x260   :  { %v441_v23 = vsel %vm413_vm2, %v965_v22, 0.0 }
 0x261   :  { %442 = vadd.xlane.f32.xlu1 %v441_v23  ;;  %v954_v23 = vld [vmem:[#allocation5 + $0x38] sm:$0xff]  }
 0x262   :  { %908 = vmatpush3.bf16.msra.mxu0 %v954_v23 }
 0x263   :  { %v967_v24 = vpop.eup %966  ;;  %909 = vmatprep.subr.bf16.mxu0 %v1072_v9 }
 0x264   :  { %v444_v25 = vsel %vm413_vm2, %v967_v24, 0.0 }
 0x265   :  { %445 = vadd.xlane.f32.xlu0 %v444_v25  ;;  %v956_v25 = vld [vmem:[#allocation5 + $0x28] sm:$0xff]  }
 0x267   :  { %v969_v26 = vpop.eup %968 }
 0x268   :  { %v447_v27 = vsel %vm413_vm2, %v969_v26, 0.0 }
 0x269   :  { %448 = vadd.xlane.f32.xlu1 %v447_v27  ;;  %v958_v27 = vld [vmem:[#allocation5 + $0x18] sm:$0xff]  }
 0x2e6   :  { %v440_v28 = vpop.xlane.xlu0 %439 }
 0x2e7   :  { %970 = vrcp.f32 %v440_v28  ;;  %v959_v28 = vld [vmem:[#allocation5 + $0x10] sm:$0xff]  }
 0x2ea   :  { %v443_v29 = vpop.xlane.xlu1 %442 }
 0x2eb   :  { %972 = vrcp.f32 %v443_v29  ;;  %v960_v29 = vld [vmem:[#allocation5 + $0x8] sm:$0xff]  }
 0x2ee   :  { %v446_v30 = vpop.xlane.xlu0 %445 }
 0x2ef   :  { %974 = vrcp.f32 %v446_v30  ;;  %v85_v30 = vsub.s32 2, %v1144_v11 }
 0x2f2   :  { %v449_v31 = vpop.xlane.xlu1 %448 }
 0x2f3   :  { %976 = vrcp.f32 %v449_v31  ;;  %v86_v31 = vrot.slane %v1147_v13, %v85_v30 }
 0x2f4   :  { %v971_v32 = vpop.eup %970 }
 0x2f5   :  { %v454_v33 = vmul.f32 %v971_v32, %v963_v20  ;;  %v227_v32 = vadd.f32 %v1166_v42, %v86_v31  ;;  %v238_v13 = vadd.f32 %v1168_v43, %v86_v31 }
 0x2f7   :  { %v458_v34 = vsel %vm413_vm2, %v454_v33, 0.0 }
 0x2f8   :  { %v973_v35 = vpop.eup %972  ;;  %v459_v36 = vrot.slane %v458_v34, 4 }
 0x2f9   :  { %v455_v37 = vmul.f32 %v973_v35, %v965_v22  ;;  %v953_v22 = vld [vmem:[#allocation2] sm:$0xff]   ;;  %v230_v35 = vadd.f32 %v1170_v44, %v86_v31 }
 0x2fa   :  { %v460_v39 = vadd.f32 %v459_v36, %v458_v34  ;;  %902 = vmatpush3.bf16.msra.mxu1 %v953_v22 }
 0x2fb   :  { %v465_v40 = vsel %vm413_vm2, %v455_v37, 0.0 }
 0x2fc   :  { %v975_v45 = vpop.eup %974  ;;  %v461_v46 = vrot.slane %v460_v39, 2  ;;  %v466_v47 = vrot.slane %v465_v40, 4 }
 0x2fd   :  { %v456_v48 = vmul.f32 %v975_v45, %v967_v24  ;;  %v955_v24 = vld [vmem:[#allocation5 + $0x30] sm:$0xff]  }
 0x2fe   :  { %v462_v50 = vadd.f32 %v461_v46, %v460_v39  ;;  %v467_v51 = vadd.f32 %v466_v47, %v465_v40  ;;  %910 = vmatpush3.bf16.msra.mxu0 %v955_v24  ;;  %v235_v40 = vadd.f32 %v1164_v41, %v86_v31  ;;  %v816_v24 = vld [vmem:[#allocation7 + $0x2] ss:$0 sm:$0xff] }
 0x2ff   :  { %v472_v52 = vsel %vm413_vm2, %v456_v48, 0.0  ;;  %911 = vmatprep.subr.bf16.mxu0 %v1072_v9 }
 0x300   :  { %v977_v53 = vpop.eup %976  ;;  %v463_v54 = vrot.slane %v462_v50, 1  ;;  %v468_v55 = vrot.slane %v467_v51, 2  ;;  %v473_v56 = vrot.slane %v472_v52, 4 }
 0x301   :  { %v457_v57 = vmul.f32 %v977_v53, %v969_v26  ;;  %v957_v26 = vld [vmem:[#allocation5 + $0x20] sm:$0xff]  }
 0x302   :  { %v464_v59 = vadd.f32 %v463_v54, %v462_v50  ;;  %v469_v60 = vadd.f32 %v468_v55, %v467_v51  ;;  %v474_v61 = vadd.f32 %v473_v56, %v472_v52  ;;  %912 = vmatpush3.bf16.msra.mxu0 %v956_v25 }
 0x303   :  { %v479_v62 = vsel %vm413_vm2, %v457_v57, 0.0  ;;  %913 = vmatprep.subr.bf16.mxu0 %v1072_v9 }
 0x304   :  { %v487_v63 = vmul.f32 0.125, %v464_v59  ;;  %v470_v0 = vrot.slane %v469_v60, 1  ;;  %v475_v1 = vrot.slane %v474_v61, 2  ;;  %v480_v2 = vrot.slane %v479_v62, 4 }
 0x306   :  { %492 = vbcast.lane.b32.xlu0 %v487_v63, 256  ;;  %v471_v4 = vadd.f32 %v470_v0, %v469_v60  ;;  %v476_v5 = vadd.f32 %v475_v1, %v474_v61  ;;  %v481_v6 = vadd.f32 %v480_v2, %v479_v62  ;;  %914 = vmatpush3.bf16.msra.mxu0 %v957_v26 }
 0x307   :  { %915 = vmatprep.subr.bf16.mxu0 %v1072_v9 }
 0x308   :  { %v488_v7 = vmul.f32 0.125, %v471_v4  ;;  %v477_v8 = vrot.slane %v476_v5, 1  ;;  %v482_v10 = vrot.slane %v481_v6, 2 }
 0x30a   :  { %495 = vbcast.lane.b32.xlu1 %v488_v7, 256  ;;  %v478_v14 = vadd.f32 %v477_v8, %v476_v5  ;;  %v483_v15 = vadd.f32 %v482_v10, %v481_v6  ;;  %916 = vmatpush3.bf16.msra.mxu0 %v958_v27 }
 0x30b   :  { %917 = vmatprep.subr.bf16.mxu0 %v1072_v9 }
 0x30c   :  { %v489_v16 = vmul.f32 0.125, %v478_v14  ;;  %v484_v17 = vrot.slane %v483_v15, 1 }
 0x30e   :  { %498 = vbcast.lane.b32.xlu1 %v489_v16, 256  ;;  %v485_v19 = vadd.f32 %v484_v17, %v483_v15  ;;  %918 = vmatpush3.bf16.msra.mxu0 %v959_v28  ;;  %v961_v16 = vld [vmem:[#allocation5] sm:$0xff]  }
 0x30f   :  { %919 = vmatprep.subr.bf16.mxu0 %v1072_v9  ;;  %v807_v17 = vld [vmem:[#allocation7 + $0x1] ss:$0 sm:$0xff] }
 0x310   :  { %v490_v20 = vmul.f32 0.125, %v485_v19 }
 0x312   :  { %501 = vbcast.lane.b32.xlu1 %v490_v20, 256  ;;  %920 = vmatpush3.bf16.msra.mxu0 %v960_v29 }
 0x313   :  { %921 = vmatprep.subr.bf16.mxu0 %v1072_v9 }
 0x316   :  { %922 = vmatpush3.bf16.msra.mxu0 %v961_v16 }
 0x378   :  { %v493_v33 = vpop.permute.xlu0 %492 }
 0x379   :  { %v503_v34 = vmul.f32 %v493_v33, %v227_v32 }
 0x37b   :  { %v507_v36 = vrot.slane %v503_v34, 4 }
 0x37c   :  { %v496_v37 = vpop.permute.xlu1 %495 }
 0x37d   :  { %v508_v38 = vadd.f32 %v507_v36, %v503_v34  ;;  %v504_v39 = vmul.f32 %v496_v37, %v230_v35 }
 0x37f   :  { %v509_v45 = vrot.slane %v508_v38, 2  ;;  %v513_v46 = vrot.slane %v504_v39, 4 }
 0x380   :  { %v499_v47 = vpop.permute.xlu1 %498 }
 0x381   :  { %v510_v9 = vadd.f32 %v509_v45, %v508_v38  ;;  %v514_v48 = vadd.f32 %v513_v46, %v504_v39  ;;  %v505_v11 = vmul.f32 %v499_v47, %v235_v40 }
 0x383   :  { %v515_v49 = vrot.slane %v514_v48, 2  ;;  %v519_v42 = vrot.slane %v505_v11, 4  ;;  %v511_v50 = vrot.slane %v510_v9, 1 }
 0x384   :  { %v502_v51 = vpop.permute.xlu1 %501 }
 0x385   :  { %v516_v52 = vadd.f32 %v515_v49, %v514_v48  ;;  %v520_v44 = vadd.f32 %v519_v42, %v505_v11  ;;  %v506_v53 = vmul.f32 %v502_v51, %v238_v13  ;;  %v512_v57 = vadd.f32 %v511_v50, %v510_v9 }
 0x387   :  { %v517_v54 = vrot.slane %v516_v52, 1  ;;  %v521_v55 = vrot.slane %v520_v44, 2  ;;  %v525_v56 = vrot.slane %v506_v53, 4  ;;  %v531_v63 = vpack.c.bf16 %v512_v57, %v512_v57 }
 0x389   :  { %v518_v41 = vadd.f32 %v517_v54, %v516_v52  ;;  %v522_v58 = vadd.f32 %v521_v55, %v520_v44  ;;  %v526_v59 = vadd.f32 %v525_v56, %v506_v53  ;;  %v560_v4 = vunpack.c.l.b16 %v531_v63 }
 0x38b   :  { %v532_v60 = vpack.c.bf16 %v518_v41, %v518_v41  ;;  %v523_v61 = vrot.slane %v522_v58, 1  ;;  %v527_v62 = vrot.slane %v526_v59, 2 }
 0x38d   :  { %v524_v0 = vadd.f32 %v523_v61, %v522_v58  ;;  %v528_v43 = vadd.f32 %v527_v62, %v526_v59  ;;  %v561_v1 = vunpack.c.l.b16 %v532_v60 }
 0x38f   :  { %v533_v2 = vpack.c.bf16 %v524_v0, %v524_v0  ;;  %v529_v3 = vrot.slane %v528_v43, 1  ;;  %v565_v7 = vsel %vm564_vm3, %v561_v1, %v560_v4 }
 0x391   :  { %v562_v5 = vunpack.c.l.b16 %v533_v2  ;;  %v530_v6 = vadd.f32 %v529_v3, %v528_v43 }
 0x393   :  { %v534_v8 = vpack.c.bf16 %v530_v6, %v530_v6  ;;  %v567_v10 = vsel %vm566_vm4, %v562_v5, %v565_v7 }
 0x395   :  { %v563_v12 = vunpack.c.l.b16 %v534_v8 }
 0x397   :  { %v569_v14 = vsel %vm568_vm5, %v563_v12, %v567_v10 }
 0x398   :  { %v570_v15 = vpack.c.b16 %v569_v14, %v569_v14 }
 0x39a   :  { %904 = vmatmul.mubr.bf16.vlgmr.msra.gmra.mxu1 %v570_v15 }
 0x45a   :  { %v654_v18 = vpop.f32.mrf.mxu1 }
 0x45b   :  { %v655_v19 = vadd.f32 %v807_v17, %v654_v18 }
 0x45c   :  { %v905_v20 = vpop.f32.mrf.mxu1 }
 0x45d   :  { %v660_v21 = vpack.c.bf16 %v655_v19, %v655_v19 }
 0x45e   :  { %v657_v22 = vpop.f32.mrf.mxu1 }
 0x45f   :  { %924 = vmatmul.mubr.bf16.vlgmr.msra.gmra.mxu0 %v660_v21 }
 0x460   :  { %v906_v23 = vpop.f32.mrf.mxu1 }
 0x51f   :  { %v764_v25 = vpop.f32.mrf.mxu0 }
 0x520   :  { %v765_v26 = vadd.f32 %v816_v24, %v764_v25 }
 0x521   :  { %v925_v27 = vpop.f32.mrf.mxu0 }
 0x522   :  { %v770_v28 = vmul.f32 %v765_v26, %v765_v26 }
 0x523   :  { %v767_v29 = vpop.f32.mrf.mxu0 }
 0x524   :  { %v772_v30 = vsel %vm771_vm6, %v770_v28, 0.0 }
 0x525   :  { %773 = vadd.xlane.f32.xlu0 %v772_v30  ;;  %v926_v31 = vpop.f32.mrf.mxu0 }
 0x5ae   :  { %v774_v32 = vpop.xlane.xlu0 %773 }
 0x5af   :  { %v775_v33 = vmax.f32 %v774_v32, 1e-24 }
 0x5b1   :  { %978 = vrsqrt.f32 %v775_v33 }
 0x5be   :  { %v979_v34 = vpop.eup %978 }
 0x5bf   :  { %v777_v35 = vmul.f32 %v979_v34, %v765_v26 }
 0x5c1   :  { %778 = vst [vmem:[#allocation8] sm:$0xf] %v777_v35 }
 0x5c2   :  { %1051 = shalt.err (!%p1048_p5)
}
 0x5c3   :  { %788 = dma.vmem_to_hbm [thread:$0]  %s786_s1, 64, %s1212_s5, [#allocation4]  }
 0x5c4   :  { %1064 = dma.done.wait [#allocation4], 64  }
 0x5c5   :  { %1065 = vsyncadd [#allocation4], 4294967232 }
 0x5c6   :  { %792 = vsyncpa [#allocation3], 1 }
 0x5c7   :  { %793 = vsyncpa [#allocation6], 1 }
 0x5c8   :  { %794 = vsyncpa [#allocation4], 1 }

// kernel: text_encoder_forward.1
= control target key start
LH: loop header
LB: loop body
LE: loop exit
PB: predicated region body
PF: predicated region fallthrough
CT: control target
= control target key end

     0   :  { %10 = vsyncpa [#allocation3], 0  ;;  %s1207_s0 = inlined_call_operand.vmem [shape: bf16[4,8,32], index: 0, kind: input, shape index: {}]   ;;  %s1208_s1 = inlined_call_operand.vmem [shape: bf16[32,384], index: 1, kind: input, shape index: {}]   ;;  %s1209_s2 = inlined_call_operand.hbm [shape: bf16[128,128], index: 2, kind: input, shape index: {}]   ;;  %s1210_s3 = inlined_call_operand.hbm [shape: bf16[128,128], index: 3, kind: input, shape index: {}]   ;;  %s1211_s4 = inlined_call_operand.hbm [shape: f32[3,384], index: 4, kind: input, shape index: {}]   ;;  %s1212_s5 = inlined_call_operand.hbm [shape: f32[4,128], index: 5, kind: output, shape index: {}]  }
   0x1   :  { %11 = vsyncpa [#allocation6], 0 }
   0x2   :  { %12 = vsyncpa [#allocation4], 0  ;;  %s1066_s18 = smov [#allocation5]   ;;  %s1067_s20 = smov [#allocation2]  }
   0x3   :  { %s34_s19 = sshll.u32 %s1066_s18, 4  ;;  %s22_s21 = sshll.u32 %s1067_s20, 4  ;;  %s35_s19 = int_to_ptr.vmem [resolvable:$true] %s34_s19  ;;  %s23_s21 = int_to_ptr.vmem [resolvable:$true] %s22_s21 }
   0x4   :  { %s988_s22 = scalar_lea.vmem %s35_s19, 1024  ;;  %p993_p1 = scmp.lt.s32.totalorder %s35_s19, %s35_s19 }
   0x5   :  { %p989_p0 = scmp.ne.s32.totalorder %s35_s19, %s988_s22  ;;  %p994_p2 = scmp.lt.s32.totalorder %s988_s22, %s988_s22 }
   0x7   :  { %p995_p3 = por %p994_p2, %p993_p1 }
   0x9   :  { %p996_p4 = pnand %p995_p3, %p989_p0 }
   0xb   :  { %999 = shalt.err (!%p996_p4)
}
   0xc   :  { %s1068_s23 = smov 64   ;;  %s1069_s24 = smov 4  }
   0xd   :  { %40 = dma.hbm_to_vmem [thread:$0]  %s1210_s3, 1024, %s35_s19, [#allocation6], %s1068_s23, %s1068_s23, %s1069_s24  }
   0xe   :  { %s1008_s27 = scalar_lea.vmem %s23_s21, 1024  ;;  %p1013_p6 = scmp.lt.s32.totalorder %s23_s21, %s23_s21 }
   0xf   :  { %p1009_p5 = scmp.ne.s32.totalorder %s23_s21, %s1008_s27  ;;  %p1014_p7 = scmp.lt.s32.totalorder %s1008_s27, %s1008_s27 }
  0x11   :  { %p1015_p8 = por %p1014_p7, %p1013_p6 }
  0x13   :  { %p1016_p9 = pnand %p1015_p8, %p1009_p5 }
  0x15   :  { %1019 = shalt.err (!%p1016_p9)
}
  0x16   :  { %28 = dma.hbm_to_vmem [thread:$0]  %s1209_s2, 1024, %s23_s21, [#allocation3], %s1068_s23, %s1068_s23, %s1069_s24  }
  0x17   :  { %s1070_s30 = smov [#allocation7]  }
  0x18   :  { %s47_s6 = sshll.u32 %s1070_s30, 4  ;;  %s48_s6 = int_to_ptr.vmem [resolvable:$true] %s47_s6 }
  0x19   :  { %s1028_s7 = scalar_lea.vmem %s48_s6, 192  ;;  %p1033_p11 = scmp.lt.s32.totalorder %s48_s6, %s48_s6 }
  0x1a   :  { %p1029_p10 = scmp.ne.s32.totalorder %s48_s6, %s1028_s7  ;;  %p1034_p12 = scmp.lt.s32.totalorder %s1028_s7, %s1028_s7 }
  0x1c   :  { %p1035_p13 = por %p1034_p12, %p1033_p11 }
  0x1e   :  { %p1036_p0 = pnand %p1035_p13, %p1029_p10 }
  0x20   :  { %1039 = shalt.err (!%p1036_p0)
}
  0x21   :  { %50 = dma.hbm_to_vmem [thread:$0]  %s1211_s4, 192, %s48_s6, [#allocation6]  }
  0x22   :  { %1060 = dma.done.wait [#allocation3], 1024  }
  0x23   :  { %1061 = vsyncadd [#allocation3], 4294966272 }
  0x24   :  { %1062 = dma.done.wait [#allocation6], 1216  }
  0x25   :  { %1063 = vsyncadd [#allocation6], 4294966080  ;;  %v1071_v0 = vmov 0   ;;  %v936_v1 = vld [vmem:[%s1208_s1 + $0x1c] ss:$12 sps:$4 sm:$0xff]   ;;  %v942_v5 = vld [vmem:[%s1207_s0] sm:$0xff]   ;;  %v75_v10 = vlaneseq }
  0x26   :  { %171 = vmatprep.mubr.bf16.mxu0 %v1071_v0  ;;  %v938_v2 = vld [vmem:[%s1208_s1 + $0x18] ss:$12 sps:$4 sm:$0xff]   ;;  %151 = vmatprep.subr.bf16.mxu0 %v936_v1  ;;  %v941_v4 = vld [vmem:[%s1208_s1] ss:$12 sps:$4 sm:$0xff]   ;;  %vm132_vm0 = vcmask 261120   ;;  %v1072_v9 = vmov 0.0  }
  0x27   :  { %v939_v3 = vld [vmem:[%s1208_s1 + $0x4] ss:$12 sps:$4 sm:$0xff]   ;;  %152 = vmatpush1.bf16.msra.mxu0 %v938_v2  ;;  %v944_v6 = vld [vmem:[%s1208_s1 + $0x20] ss:$12 sps:$4 sm:$0xff]   ;;  %859 = vmatprep.mubr.msk.bf16.mxu1 %vm132_vm0, %v942_v5  ;;  %v945_v8 = vld [vmem:[%s1208_s1 + $0x8] ss:$12 sps:$4 sm:$0xff]  }
  0x28   :  { %153 = vmatprep.subr.bf16.mxu0 %v939_v3  ;;  %855 = vmatprep.subr.bf16.mxu1 %v944_v6  ;;  %v943_v7 = vld [vmem:[%s1207_s0 + $0x8] sm:$0xff]   ;;  %vm1073_vm1 = vmmov 0   ;;  %v1144_v11 = vshrl.u32 %v75_v10, 7  ;;  %v1147_v13 = vld [vmem:[#allocation7] ss:$4 sm:$0x7] }
  0x29   :  { %856 = vmatpush3.bf16.msra.mxu1 %v944_v6  ;;  %vm413_vm2 = vcmask 64512   ;;  %vm564_vm3 = vcmask 1041409   ;;  %vm566_vm4 = vcmask 1042434   ;;  %vm568_vm5 = vcmask 1043459   ;;  %s1074_s0 = smov [#allocation8]  }
  0x2a   :  { %857 = vmatprep.subr.bf16.mxu1 %v945_v8  ;;  %v81_v12 = vsub.s32 1, %v1144_v11  ;;  %v77_v15 = vsub.s32 0, %v1144_v11  ;;  %vm771_vm6 = vcmask 1043456   ;;  %s785_s1 = sshll.u32 %s1074_s0, 4  ;;  %s786_s1 = int_to_ptr.vmem [resolvable:$true] %s785_s1 }
  0x2b   :  { %154 = vmatpush1.bf16.msra.mxu0 %v941_v4  ;;  %s1040_s23 = scalar_lea.vmem %s786_s1, 64  ;;  %p1045_p2 = scmp.lt.s32.totalorder %s786_s1, %s786_s1 }
  0x2c   :  { %869 = vmatprep.subr.bf16.mxu0 %v1072_v9  ;;  %v82_v14 = vrot.slane %v1147_v13, %v81_v12  ;;  %v78_v19 = vrot.slane %v1147_v13, %v77_v15  ;;  %p1041_p1 = scmp.ne.s32.totalorder %s786_s1, %s1040_s23  ;;  %p1046_p3 = scmp.lt.s32.totalorder %s1040_s23, %s1040_s23 }
  0x2d   :  { %858 = vmatpush3.bf16.msra.mxu1 %v945_v8 }
  0x2e   :  { %803 = vmatmul.mubr.msk.bf16.vlgmr.msra.gmra.mxu0 %vm132_vm0, %v942_v5  ;;  %863 = vmatprep.subr.bf16.mxu1 %v1072_v9  ;;  %p1047_p4 = por %p1046_p3, %p1045_p2 }
  0x2f   :  { %181 = vmatprep.mubr.bf16.mxu0 %v1071_v0 }
  0x30   :  { %860 = vmatmul.mubr.msk.bf16.vlgmr.msra.gmra.mxu1 %vm132_vm0, %v943_v7  ;;  %p1048_p5 = pnand %p1047_p4, %p1041_p1 }
  0x31   :  { %865 = vmatprep.mubr.msk.bf16.mxu1 %vm1073_vm1, %v1072_v9 }
  0x36   :  { %804 = vmatmul.mubr.msk.bf16.gmra.mxu0 %vm132_vm0, %v943_v7 }
  0x37   :  { %871 = vmatprep.mubr.msk.bf16.mxu0 %vm1073_vm1, %v1072_v9 }
  0xee   :  { %v173_v16 = vpop.f32.mrf.mxu0 }
  0xef   :  { %v174_v24 = vadd.f32 %v173_v16, %v78_v19 }
  0xf0   :  { %v175_v17 = vpop.f32.mrf.mxu0  ;;  %v1164_v41 = vpop.f32.mrf.mxu1 }
  0xf1   :  { %v176_v18 = vadd.f32 %v175_v17, %v82_v14  ;;  %v241_v29 = vpack.c.bf16 %v174_v24, %v174_v24 }
  0xf2   :  { %v177_v20 = vpop.f32.mrf.mxu0  ;;  %v1166_v42 = vpop.f32.mrf.mxu1 }
  0xf3   :  { %v245_v21 = vpack.c.bf16 %v176_v18, %v176_v18  ;;  %v178_v30 = vadd.f32 %v177_v20, %v78_v19 }
  0xf4   :  { %v179_v22 = vpop.f32.mrf.mxu0  ;;  %v1168_v43 = vpop.f32.mrf.mxu1 }
  0xf5   :  { %v180_v23 = vadd.f32 %v179_v22, %v82_v14  ;;  %864 = vmatpush3.bf16.xpose.msra.mxu1 %v245_v21  ;;  %v242_v35 = vpack.c.bf16 %v178_v30, %v178_v30 }
  0xf6   :  { %v183_v25 = vpop.f32.mrf.mxu0  ;;  %875 = vmatprep.subr.bf16.mxu1 %v1072_v9  ;;  %v1170_v44 = vpop.f32.mrf.mxu1 }
  0xf7   :  { %v246_v26 = vpack.c.bf16 %v180_v23, %v180_v23  ;;  %v184_v36 = vadd.f32 %v183_v25, %v78_v19 }
  0xf8   :  { %v185_v27 = vpop.f32.mrf.mxu0 }
  0xf9   :  { %v186_v28 = vadd.f32 %v185_v27, %v82_v14  ;;  %870 = vmatpush3.bf16.xpose.msra.mxu0 %v246_v26  ;;  %v243_v38 = vpack.c.bf16 %v184_v36, %v184_v36 }
  0xfa   :  { %v187_v31 = vpop.f32.mrf.mxu0  ;;  %881 = vmatprep.subr.bf16.mxu0 %v1072_v9 }
  0xfb   :  { %v247_v32 = vpack.c.bf16 %v186_v28, %v186_v28  ;;  %v188_v39 = vadd.f32 %v187_v31, %v78_v19 }
  0xfc   :  { %v189_v33 = vpop.f32.mrf.mxu0  ;;  %866 = vmatmul.mubr.bf16.vlgmr.msra.gmra.mxu1 %v241_v29 }
  0xfd   :  { %v190_v34 = vadd.f32 %v189_v33, %v82_v14  ;;  %876 = vmatpush3.bf16.xpose.msra.mxu1 %v247_v32  ;;  %877 = vmatprep.mubr.msk.bf16.mxu1 %vm1073_vm1, %v1072_v9  ;;  %v244_v40 = vpack.c.bf16 %v188_v39, %v188_v39 }
  0xfe   :  { %887 = vmatprep.subr.bf16.mxu1 %v1072_v9 }
  0xff   :  { %v248_v37 = vpack.c.bf16 %v190_v34, %v190_v34 }
 0x100   :  { %872 = vmatmul.mubr.bf16.vlgmr.msra.gmra.mxu0 %v242_v35 }
 0x101   :  { %882 = vmatpush3.bf16.xpose.msra.mxu0 %v248_v37  ;;  %883 = vmatprep.mubr.msk.bf16.mxu0 %vm1073_vm1, %v1072_v9 }
 0x102   :  { %907 = vmatprep.subr.bf16.mxu0 %v1072_v9 }
 0x104   :  { %878 = vmatmul.mubr.bf16.vlgmr.msra.gmra.mxu1 %v243_v38  ;;  %v946_v38 = vld [vmem:[#allocation2 + $0x38] sm:$0xff]  }
 0x105   :  { %903 = vmatprep.mubr.msk.bf16.mxu1 %vm1073_vm1, %v1072_v9  ;;  %888 = vmatpush3.bf16.msra.mxu1 %v946_v38 }
 0x106   :  { %889 = vmatprep.subr.bf16.mxu1 %v1072_v9 }
 0x108   :  { %884 = vmatmul.mubr.bf16.vlgmr.msra.gmra.mxu0 %v244_v40 }
 0x109   :  { %923 = vmatprep.mubr.msk.bf16.mxu0 %vm1073_vm1, %v1072_v9 }
 0x1bc   :  { %v283_v45 = vpop.f32.mrf.mxu1 }
 0x1bd   :  { %v409_v46 = vmul.f32 0.17677669, %v283_v45 }
 0x1be   :  { %v867_v47 = vpop.f32.mrf.mxu1 }
 0x1bf   :  { %v414_v48 = vsel %vm413_vm2, %v409_v46, -inf }
 0x1c0   :  { %v323_v49 = vpop.f32.mrf.mxu0  ;;  %415 = vmax.xlane.f32.xlu0 %v414_v48  ;;  %v286_v50 = vpop.f32.mrf.mxu1 }
 0x1c1   :  { %v410_v51 = vmul.f32 0.17677669, %v323_v49  ;;  %v947_v49 = vld [vmem:[#allocation2 + $0x30] sm:$0xff]  }
 0x1c2   :  { %v868_v52 = vpop.f32.mrf.mxu1  ;;  %v873_v53 = vpop.f32.mrf.mxu0  ;;  %890 = vmatpush3.bf16.msra.mxu1 %v947_v49 }
 0x1c3   :  { %v417_v54 = vsel %vm413_vm2, %v410_v51, -inf  ;;  %891 = vmatprep.subr.bf16.mxu1 %v1072_v9 }
 0x1c4   :  { %v326_v55 = vpop.f32.mrf.mxu0  ;;  %418 = vmax.xlane.f32.xlu0 %v417_v54  ;;  %v363_v56 = vpop.f32.mrf.mxu1 }
 0x1c5   :  { %v411_v57 = vmul.f32 0.17677669, %v363_v56 }
 0x1c6   :  { %v874_v58 = vpop.f32.mrf.mxu0  ;;  %v879_v59 = vpop.f32.mrf.mxu1 }
 0x1c7   :  { %v420_v60 = vsel %vm413_vm2, %v411_v57, -inf  ;;  %v948_v58 = vld [vmem:[#allocation2 + $0x28] sm:$0xff]  }
 0x1c8   :  { %v403_v61 = vpop.f32.mrf.mxu0  ;;  %421 = vmax.xlane.f32.xlu1 %v420_v60  ;;  %v366_v62 = vpop.f32.mrf.mxu1  ;;  %892 = vmatpush3.bf16.msra.mxu1 %v948_v58 }
 0x1c9   :  { %v412_v63 = vmul.f32 0.17677669, %v403_v61  ;;  %893 = vmatprep.subr.bf16.mxu1 %v1072_v9 }
 0x1ca   :  { %v880_v0 = vpop.f32.mrf.mxu1  ;;  %v885_v1 = vpop.f32.mrf.mxu0 }
 0x1cb   :  { %v423_v2 = vsel %vm413_vm2, %v412_v63, -inf }
 0x1cc   :  { %v406_v3 = vpop.f32.mrf.mxu0  ;;  %424 = vmax.xlane.f32.xlu1 %v423_v2 }
 0x1cd   :  { %v949_v3 = vld [vmem:[#allocation2 + $0x20] sm:$0xff]  }
 0x1ce   :  { %v886_v4 = vpop.f32.mrf.mxu0  ;;  %894 = vmatpush3.bf16.msra.mxu1 %v949_v3 }
 0x1cf   :  { %895 = vmatprep.subr.bf16.mxu1 %v1072_v9 }
 0x249   :  { %v416_v5 = vpop.xlane.xlu0 %415 }
 0x24a   :  { %v426_v6 = vsub.f32 %v409_v46, %v416_v5 }
 0x24c   :  { %v430_v7 = vmul.f32 1.442695, %v426_v6 }
 0x24d   :  { %v419_v8 = vpop.xlane.xlu0 %418 }
 0x24e   :  { %962 = vpow2.f32 %v430_v7  ;;  %v427_v10 = vsub.f32 %v410_v51, %v419_v8 }
 0x250   :  { %v432_v12 = vmul.f32 1.442695, %v427_v10 }
 0x251   :  { %v422_v14 = vpop.xlane.xlu1 %421 }
 0x252   :  { %964 = vpow2.f32 %v432_v12  ;;  %v428_v15 = vsub.f32 %v411_v57, %v422_v14  ;;  %v950_v12 = vld [vmem:[#allocation2 + $0x18] sm:$0xff]  }
 0x253   :  { %896 = vmatpush3.bf16.msra.mxu1 %v950_v12 }
 0x254   :  { %v434_v16 = vmul.f32 1.442695, %v428_v15  ;;  %897 = vmatprep.subr.bf16.mxu1 %v1072_v9 }
 0x255   :  { %v425_v17 = vpop.xlane.xlu1 %424 }
 0x256   :  { %966 = vpow2.f32 %v434_v16  ;;  %v429_v18 = vsub.f32 %v412_v63, %v425_v17 }
 0x258   :  { %v436_v19 = vmul.f32 1.442695, %v429_v18  ;;  %v951_v18 = vld [vmem:[#allocation2 + $0x10] sm:$0xff]  }
 0x259   :  { %898 = vmatpush3.bf16.msra.mxu1 %v951_v18 }
 0x25a   :  { %968 = vpow2.f32 %v436_v19  ;;  %899 = vmatprep.subr.bf16.mxu1 %v1072_v9 }
 0x25b   :  { %v963_v20 = vpop.eup %962 }
 0x25c   :  { %v438_v21 = vsel %vm413_vm2, %v963_v20, 0.0 }
 0x25d   :  { %439 = vadd.xlane.f32.xlu0 %v438_v21  ;;  %v952_v21 = vld [vmem:[#allocation2 + $0x8] sm:$0xff]  }
 0x25e   :  { %900 = vmatpush3.bf16.msra.mxu1 %v952_v21 }
 0x25f   :  { %v965_v22 = vpop.eup %964  ;;  %901 = vmatprep.subr.bf16.mxu1 %v1072_v9 }
 0x260   :  { %v441_v23 = vsel %vm413_vm2, %v965_v22, 0.0 }
 0x261   :  { %442 = vadd.xlane.f32.xlu1 %v441_v23  ;;  %v954_v23 = vld [vmem:[#allocation5 + $0x38] sm:$0xff]  }
 0x262   :  { %908 = vmatpush3.bf16.msra.mxu0 %v954_v23 }
 0x263   :  { %v967_v24 = vpop.eup %966  ;;  %909 = vmatprep.subr.bf16.mxu0 %v1072_v9 }
 0x264   :  { %v444_v25 = vsel %vm413_vm2, %v967_v24, 0.0 }
 0x265   :  { %445 = vadd.xlane.f32.xlu0 %v444_v25  ;;  %v956_v25 = vld [vmem:[#allocation5 + $0x28] sm:$0xff]  }
 0x267   :  { %v969_v26 = vpop.eup %968 }
 0x268   :  { %v447_v27 = vsel %vm413_vm2, %v969_v26, 0.0 }
 0x269   :  { %448 = vadd.xlane.f32.xlu1 %v447_v27  ;;  %v958_v27 = vld [vmem:[#allocation5 + $0x18] sm:$0xff]  }
 0x2e6   :  { %v440_v28 = vpop.xlane.xlu0 %439 }
 0x2e7   :  { %970 = vrcp.f32 %v440_v28  ;;  %v959_v28 = vld [vmem:[#allocation5 + $0x10] sm:$0xff]  }
 0x2ea   :  { %v443_v29 = vpop.xlane.xlu1 %442 }
 0x2eb   :  { %972 = vrcp.f32 %v443_v29  ;;  %v960_v29 = vld [vmem:[#allocation5 + $0x8] sm:$0xff]  }
 0x2ee   :  { %v446_v30 = vpop.xlane.xlu0 %445 }
 0x2ef   :  { %974 = vrcp.f32 %v446_v30  ;;  %v85_v30 = vsub.s32 2, %v1144_v11 }
 0x2f2   :  { %v449_v31 = vpop.xlane.xlu1 %448 }
 0x2f3   :  { %976 = vrcp.f32 %v449_v31  ;;  %v86_v31 = vrot.slane %v1147_v13, %v85_v30 }
 0x2f4   :  { %v971_v32 = vpop.eup %970 }
 0x2f5   :  { %v454_v33 = vmul.f32 %v971_v32, %v963_v20  ;;  %v227_v32 = vadd.f32 %v1166_v42, %v86_v31  ;;  %v238_v13 = vadd.f32 %v1168_v43, %v86_v31 }
 0x2f7   :  { %v458_v34 = vsel %vm413_vm2, %v454_v33, 0.0 }
 0x2f8   :  { %v973_v35 = vpop.eup %972  ;;  %v459_v36 = vrot.slane %v458_v34, 4 }
 0x2f9   :  { %v455_v37 = vmul.f32 %v973_v35, %v965_v22  ;;  %v953_v22 = vld [vmem:[#allocation2] sm:$0xff]   ;;  %v230_v35 = vadd.f32 %v1170_v44, %v86_v31 }
 0x2fa   :  { %v460_v39 = vadd.f32 %v459_v36, %v458_v34  ;;  %902 = vmatpush3.bf16.msra.mxu1 %v953_v22 }
 0x2fb   :  { %v465_v40 = vsel %vm413_vm2, %v455_v37, 0.0 }
 0x2fc   :  { %v975_v45 = vpop.eup %974  ;;  %v461_v46 = vrot.slane %v460_v39, 2  ;;  %v466_v47 = vrot.slane %v465_v40, 4 }
 0x2fd   :  { %v456_v48 = vmul.f32 %v975_v45, %v967_v24  ;;  %v955_v24 = vld [vmem:[#allocation5 + $0x30] sm:$0xff]  }
 0x2fe   :  { %v462_v50 = vadd.f32 %v461_v46, %v460_v39  ;;  %v467_v51 = vadd.f32 %v466_v47, %v465_v40  ;;  %910 = vmatpush3.bf16.msra.mxu0 %v955_v24  ;;  %v235_v40 = vadd.f32 %v1164_v41, %v86_v31  ;;  %v816_v24 = vld [vmem:[#allocation7 + $0x2] ss:$0 sm:$0xff] }
 0x2ff   :  { %v472_v52 = vsel %vm413_vm2, %v456_v48, 0.0  ;;  %911 = vmatprep.subr.bf16.mxu0 %v1072_v9 }
 0x300   :  { %v977_v53 = vpop.eup %976  ;;  %v463_v54 = vrot.slane %v462_v50, 1  ;;  %v468_v55 = vrot.slane %v467_v51, 2  ;;  %v473_v56 = vrot.slane %v472_v52, 4 }
 0x301   :  { %v457_v57 = vmul.f32 %v977_v53, %v969_v26  ;;  %v957_v26 = vld [vmem:[#allocation5 + $0x20] sm:$0xff]  }
 0x302   :  { %v464_v59 = vadd.f32 %v463_v54, %v462_v50  ;;  %v469_v60 = vadd.f32 %v468_v55, %v467_v51  ;;  %v474_v61 = vadd.f32 %v473_v56, %v472_v52  ;;  %912 = vmatpush3.bf16.msra.mxu0 %v956_v25 }
 0x303   :  { %v479_v62 = vsel %vm413_vm2, %v457_v57, 0.0  ;;  %913 = vmatprep.subr.bf16.mxu0 %v1072_v9 }
 0x304   :  { %v487_v63 = vmul.f32 0.125, %v464_v59  ;;  %v470_v0 = vrot.slane %v469_v60, 1  ;;  %v475_v1 = vrot.slane %v474_v61, 2  ;;  %v480_v2 = vrot.slane %v479_v62, 4 }
 0x306   :  { %492 = vbcast.lane.b32.xlu0 %v487_v63, 256  ;;  %v471_v4 = vadd.f32 %v470_v0, %v469_v60  ;;  %v476_v5 = vadd.f32 %v475_v1, %v474_v61  ;;  %v481_v6 = vadd.f32 %v480_v2, %v479_v62  ;;  %914 = vmatpush3.bf16.msra.mxu0 %v957_v26 }
 0x307   :  { %915 = vmatprep.subr.bf16.mxu0 %v1072_v9 }
 0x308   :  { %v488_v7 = vmul.f32 0.125, %v471_v4  ;;  %v477_v8 = vrot.slane %v476_v5, 1  ;;  %v482_v10 = vrot.slane %v481_v6, 2 }
 0x30a   :  { %495 = vbcast.lane.b32.xlu1 %v488_v7, 256  ;;  %v478_v14 = vadd.f32 %v477_v8, %v476_v5  ;;  %v483_v15 = vadd.f32 %v482_v10, %v481_v6  ;;  %916 = vmatpush3.bf16.msra.mxu0 %v958_v27 }
 0x30b   :  { %917 = vmatprep.subr.bf16.mxu0 %v1072_v9 }
 0x30c   :  { %v489_v16 = vmul.f32 0.125, %v478_v14  ;;  %v484_v17 = vrot.slane %v483_v15, 1 }
 0x30e   :  { %498 = vbcast.lane.b32.xlu1 %v489_v16, 256  ;;  %v485_v19 = vadd.f32 %v484_v17, %v483_v15  ;;  %918 = vmatpush3.bf16.msra.mxu0 %v959_v28  ;;  %v961_v16 = vld [vmem:[#allocation5] sm:$0xff]  }
 0x30f   :  { %919 = vmatprep.subr.bf16.mxu0 %v1072_v9  ;;  %v807_v17 = vld [vmem:[#allocation7 + $0x1] ss:$0 sm:$0xff] }
 0x310   :  { %v490_v20 = vmul.f32 0.125, %v485_v19 }
 0x312   :  { %501 = vbcast.lane.b32.xlu1 %v490_v20, 256  ;;  %920 = vmatpush3.bf16.msra.mxu0 %v960_v29 }
 0x313   :  { %921 = vmatprep.subr.bf16.mxu0 %v1072_v9 }
 0x316   :  { %922 = vmatpush3.bf16.msra.mxu0 %v961_v16 }
 0x378   :  { %v493_v33 = vpop.permute.xlu0 %492 }
 0x379   :  { %v503_v34 = vmul.f32 %v493_v33, %v227_v32 }
 0x37b   :  { %v507_v36 = vrot.slane %v503_v34, 4 }
 0x37c   :  { %v496_v37 = vpop.permute.xlu1 %495 }
 0x37d   :  { %v508_v38 = vadd.f32 %v507_v36, %v503_v34  ;;  %v504_v39 = vmul.f32 %v496_v37, %v230_v35 }
 0x37f   :  { %v509_v45 = vrot.slane %v508_v38, 2  ;;  %v513_v46 = vrot.slane %v504_v39, 4 }
 0x380   :  { %v499_v47 = vpop.permute.xlu1 %498 }
 0x381   :  { %v510_v9 = vadd.f32 %v509_v45, %v508_v38  ;;  %v514_v48 = vadd.f32 %v513_v46, %v504_v39  ;;  %v505_v11 = vmul.f32 %v499_v47, %v235_v40 }
 0x383   :  { %v515_v49 = vrot.slane %v514_v48, 2  ;;  %v519_v42 = vrot.slane %v505_v11, 4  ;;  %v511_v50 = vrot.slane %v510_v9, 1 }
 0x384   :  { %v502_v51 = vpop.permute.xlu1 %501 }
 0x385   :  { %v516_v52 = vadd.f32 %v515_v49, %v514_v48  ;;  %v520_v44 = vadd.f32 %v519_v42, %v505_v11  ;;  %v506_v53 = vmul.f32 %v502_v51, %v238_v13  ;;  %v512_v57 = vadd.f32 %v511_v50, %v510_v9 }
 0x387   :  { %v517_v54 = vrot.slane %v516_v52, 1  ;;  %v521_v55 = vrot.slane %v520_v44, 2  ;;  %v525_v56 = vrot.slane %v506_v53, 4  ;;  %v531_v63 = vpack.c.bf16 %v512_v57, %v512_v57 }
 0x389   :  { %v518_v41 = vadd.f32 %v517_v54, %v516_v52  ;;  %v522_v58 = vadd.f32 %v521_v55, %v520_v44  ;;  %v526_v59 = vadd.f32 %v525_v56, %v506_v53  ;;  %v560_v4 = vunpack.c.l.b16 %v531_v63 }
 0x38b   :  { %v532_v60 = vpack.c.bf16 %v518_v41, %v518_v41  ;;  %v523_v61 = vrot.slane %v522_v58, 1  ;;  %v527_v62 = vrot.slane %v526_v59, 2 }
 0x38d   :  { %v524_v0 = vadd.f32 %v523_v61, %v522_v58  ;;  %v528_v43 = vadd.f32 %v527_v62, %v526_v59  ;;  %v561_v1 = vunpack.c.l.b16 %v532_v60 }
 0x38f   :  { %v533_v2 = vpack.c.bf16 %v524_v0, %v524_v0  ;;  %v529_v3 = vrot.slane %v528_v43, 1  ;;  %v565_v7 = vsel %vm564_vm3, %v561_v1, %v560_v4 }
 0x391   :  { %v562_v5 = vunpack.c.l.b16 %v533_v2  ;;  %v530_v6 = vadd.f32 %v529_v3, %v528_v43 }
 0x393   :  { %v534_v8 = vpack.c.bf16 %v530_v6, %v530_v6  ;;  %v567_v10 = vsel %vm566_vm4, %v562_v5, %v565_v7 }
 0x395   :  { %v563_v12 = vunpack.c.l.b16 %v534_v8 }
 0x397   :  { %v569_v14 = vsel %vm568_vm5, %v563_v12, %v567_v10 }
 0x398   :  { %v570_v15 = vpack.c.b16 %v569_v14, %v569_v14 }
 0x39a   :  { %904 = vmatmul.mubr.bf16.vlgmr.msra.gmra.mxu1 %v570_v15 }
 0x45a   :  { %v654_v18 = vpop.f32.mrf.mxu1 }
 0x45b   :  { %v655_v19 = vadd.f32 %v807_v17, %v654_v18 }
 0x45c   :  { %v905_v20 = vpop.f32.mrf.mxu1 }
 0x45d   :  { %v660_v21 = vpack.c.bf16 %v655_v19, %v655_v19 }
 0x45e   :  { %v657_v22 = vpop.f32.mrf.mxu1 }
 0x45f   :  { %924 = vmatmul.mubr.bf16.vlgmr.msra.gmra.mxu0 %v660_v21 }
 0x460   :  { %v906_v23 = vpop.f32.mrf.mxu1 }
 0x51f   :  { %v764_v25 = vpop.f32.mrf.mxu0 }
 0x520   :  { %v765_v26 = vadd.f32 %v816_v24, %v764_v25 }
 0x521   :  { %v925_v27 = vpop.f32.mrf.mxu0 }
 0x522   :  { %v770_v28 = vmul.f32 %v765_v26, %v765_v26 }
 0x523   :  { %v767_v29 = vpop.f32.mrf.mxu0 }
 0x524   :  { %v772_v30 = vsel %vm771_vm6, %v770_v28, 0.0 }
 0x525   :  { %773 = vadd.xlane.f32.xlu0 %v772_v30  ;;  %v926_v31 = vpop.f32.mrf.mxu0 }
 0x5ae   :  { %v774_v32 = vpop.xlane.xlu0 %773 }
 0x5af   :  { %v775_v33 = vmax.f32 %v774_v32, 1e-24 }
 0x5b1   :  { %978 = vrsqrt.f32 %v775_v33 }
 0x5be   :  { %v979_v34 = vpop.eup %978 }
 0x5bf   :  { %v777_v35 = vmul.f32 %v979_v34, %v765_v26 }
 0x5c1   :  { %778 = vst [vmem:[#allocation8] sm:$0xf] %v777_v35 }
 0x5c2   :  { %1051 = shalt.err (!%p1048_p5)
}
 0x5c3   :  { %788 = dma.vmem_to_hbm [thread:$0]  %s786_s1, 64, %s1212_s5, [#allocation4]  }
 0x5c4   :  { %1064 = dma.done.wait [#allocation4], 64  }
 0x5c5   :  { %1065 = vsyncadd [#allocation4], 4294967232 }
 0x5c6   :  { %792 = vsyncpa [#allocation3], 1 }
 0x5c7   :  { %793 = vsyncpa [#allocation6], 1 }
 0x5c8   :  { %794 = vsyncpa [#allocation4], 1 }

</bundles_post_ra>
